<compile_context>
chip_gen: v6e
topology: v6e:2x2x1
jax: 0.10.0
libtpu: 0.0.40
codegen_flags: <defaults>
</compile_context>

<pallas_src>
import jax
import jax.numpy as jnp
from jax import lax
from jax.experimental import pallas as pl
from jax.experimental.pallas import tpu as pltpu

EPS = 1e-5
# MXU compute dtype for the matmuls (accumulation and all BN statistics stay in
# float32).  Set to jnp.float32 for bit-closer parity with the f32 PyTorch module.
CONV_DTYPE = jnp.bfloat16


# ---------------------------------------------------------------------------
# in-kernel helpers
# ---------------------------------------------------------------------------
def _taps(h):
    """k=0 / k=2 conv taps of h (C, L): h[:, l-1] and h[:, l+1], zero boundary."""
    c, l = h.shape
    col = lax.broadcasted_iota(jnp.int32, (c, l), 1)
    h_prev = jnp.where(col == 0, 0.0, pltpu.roll(h, 1, axis=1))          # h[:, l-1]
    h_next = jnp.where(col == l - 1, 0.0, pltpu.roll(h, l - 1, axis=1))  # h[:, l+1]
    return h_prev, h_next


def _conv3(h, w_prev, w_cur, w_next, acc=None):
    """Conv1d(kernel_size=3, padding=1) contribution of one channel group.

    h: (C, L) float32 activations (length on lanes).
    w_*: (C_out, C) weight refs, already in CONV_DTYPE.
    Three accumulating MXU matmuls with f32 accumulation; no im2col scratch.
    """
    h_prev, h_next = _taps(h)
    y = jnp.dot(w_cur[...], h.astype(CONV_DTYPE),
                preferred_element_type=jnp.float32)
    if acc is not None:
        y = y + acc
    y = y + jnp.dot(w_prev[...], h_prev.astype(CONV_DTYPE),
                    preferred_element_type=jnp.float32)
    y = y + jnp.dot(w_next[...], h_next.astype(CONV_DTYPE),
                    preferred_element_type=jnp.float32)
    return y


def _bn_affine(s, ss, gamma, beta, count):
    """Fold training-mode BatchNorm1d (biased variance) into a per-channel affine."""
    mean = s * (1.0 / count)
    var = jnp.maximum(ss * (1.0 / count) - mean * mean, 0.0)
    scale = gamma * lax.rsqrt(var + EPS)            # (C_out, 1)
    shift = beta - mean * scale                     # (C_out, 1)
    return scale, shift


# ---------------------------------------------------------------------------
# fused kernel: upsample + pad + concat + conv1 + BN1 + ReLU + conv2 + BN2 + ReLU
# ---------------------------------------------------------------------------
def _up_kernel(wup_ref, x1_ref, x2_ref,
               w1s_prev, w1s_cur, w1s_next,      # conv1 weights, skip (x2) channels
               w1u_prev, w1u_cur, w1u_next,      # conv1 weights, upsampled (x1) channels
               b1_ref, g1_ref, be1_ref,
               w2_prev, w2_cur, w2_next,
               b2_ref, g2_ref, be2_ref,
               out_ref):
    n_batch, _, l2 = x2_ref.shape
    c_out = out_ref.shape[1]
    count = float(n_batch * l2)

    wup = wup_ref[...]                            # (L1, L2), CONV_DTYPE

    # ---- pass 1: upsample + (weight-folded) concat + conv1, BN1 sums -------
    s1 = jnp.zeros((c_out, 1), jnp.float32)
    ss1 = jnp.zeros((c_out, 1), jnp.float32)
    y1 = []
    for n in range(n_batch):                      # N is small & static -> unrolled
        # Upsample(scale=2, linear, align_corners=True) + F.pad folded into one
        # (L1, L2) interpolation matrix -> a single MXU matmul per sample.
        x1_up = jnp.dot(x1_ref[n].astype(CONV_DTYPE), wup,
                        preferred_element_type=jnp.float32)       # (C1, L2) f32
        x2 = x2_ref[n].astype(jnp.float32)                        # (C2, L2)
        # torch.cat([x2, x1_up], dim=1) folded into the channel-split weights.
        y = _conv3(x2, w1s_prev, w1s_cur, w1s_next)
        y = _conv3(x1_up, w1u_prev, w1u_cur, w1u_next, acc=y)
        y = y + b1_ref[...]                                       # (c_out, L2) f32
        y1.append(y)
        s1 = s1 + jnp.sum(y, axis=1, keepdims=True)
        ss1 = ss1 + jnp.sum(y * y, axis=1, keepdims=True)
    sc1, sh1 = _bn_affine(s1, ss1, g1_ref[...], be1_ref[...], count)

    # ---- pass 2: BN1 + ReLU + conv2, BN2 sums -------------------------------
    s2 = jnp.zeros((c_out, 1), jnp.float32)
    ss2 = jnp.zeros((c_out, 1), jnp.float32)
    y2 = []
    for n in range(n_batch):
        h = jnp.maximum(y1[n] * sc1 + sh1, 0.0)
        y = _conv3(h, w2_prev, w2_cur, w2_next) + b2_ref[...]
        y2.append(y)
        s2 = s2 + jnp.sum(y, axis=1, keepdims=True)
        ss2 = ss2 + jnp.sum(y * y, axis=1, keepdims=True)
    sc2, sh2 = _bn_affine(s2, ss2, g2_ref[...], be2_ref[...], count)

    # ---- pass 3: BN2 + ReLU, store directly in the NCL output layout --------
    for n in range(n_batch):
        out_ref[n] = jnp.maximum(y2[n] * sc2 + sh2, 0.0).astype(out_ref.dtype)


# ---------------------------------------------------------------------------
# wrapper
# ---------------------------------------------------------------------------
def _upsample_pad_matrix(l_in, l_skip):
    """(l_skip, l_in) matrix: linear 2x upsample (align_corners=True) followed
    by F.pad([diff//2, diff - diff//2]) so the result matches the skip length."""
    l_up = 2 * l_in
    diff = l_skip - l_up
    assert diff >= 0, "skip connection must be at least 2x the length of x1"
    j = jnp.arange(l_up, dtype=jnp.float32)
    pos = j * (l_in - 1) / (l_up - 1) if l_up > 1 else jnp.zeros((l_up,), jnp.float32)
    i0 = jnp.floor(pos).astype(jnp.int32)
    i1 = jnp.minimum(i0 + 1, l_in - 1)
    w_hi = pos - i0.astype(jnp.float32)
    rows = jnp.arange(l_up)
    w = jnp.zeros((l_up, l_in), jnp.float32)
    w = w.at[rows, i0].add(1.0 - w_hi).at[rows, i1].add(w_hi)
    pad_lo = diff // 2
    return jnp.pad(w, ((pad_lo, diff - pad_lo), (0, 0)))


def _full_spec(shape):
    zeros = (0,) * len(shape)
    return pl.BlockSpec(tuple(shape), lambda i, _z=zeros: _z)


def up_forward(x1_ncl, x2_ncl, params):
    """Pallas Up(bilinear=True): (N, C1, L1), (N, C2, L2) -> (N, C_out, L2)."""
    w1, b1, g1, be1, w2, b2, g2, be2 = params
    n, c1, l1 = x1_ncl.shape
    n2, c2, l2 = x2_ncl.shape
    assert n2 == n
    c_out = w1.shape[-1]

    # Upsample + F.pad folded into one (L1, L2) matrix, pre-cast for the MXU.
    wup_t = _upsample_pad_matrix(l1, l2).T.astype(CONV_DTYPE)       # (L1, L2)

    # Per-tap conv weights as (C_out, C_in_group) matrices:
    #   w[k, c, o] == torch_w[o, c, k];  tap k applies to x[:, l + k - 1].
    # conv1 is additionally split by the torch.cat([x2, x1_up], 1) channel
    # grouping so the kernel never has to concatenate along sublanes.
    w1_t = jnp.transpose(w1, (0, 2, 1)).astype(CONV_DTYPE)          # (3, c_out, c2+c1)
    w1s = [w1_t[k, :, :c2] for k in range(3)]                       # skip (x2) group
    w1u = [w1_t[k, :, c2:] for k in range(3)]                       # upsampled (x1) group
    w2_t = jnp.transpose(w2, (0, 2, 1)).astype(CONV_DTYPE)          # (3, c_out, c_out)
    w2k = [w2_t[k] for k in range(3)]

    def col(v):                                                     # per-channel column
        return v.reshape(c_out, 1).astype(jnp.float32)

    args = (wup_t, x1_ncl, x2_ncl,
            w1s[0], w1s[1], w1s[2], w1u[0], w1u[1], w1u[2],
            col(b1), col(g1), col(be1),
            w2k[0], w2k[1], w2k[2],
            col(b2), col(g2), col(be2))

    # Single fused call; whole problem lives in VMEM (no HBM intermediates).
    # For very large N*L, tile L with a 1-element halo and split BN into a
    # partial-sum pass + affine pass (and set vmem_limit_bytes accordingly).
    return pl.pallas_call(
        _up_kernel,
        out_shape=jax.ShapeDtypeStruct((n, c_out, l2), jnp.float32),
        grid_spec=pltpu.PrefetchScalarGridSpec(
            num_scalar_prefetch=0,
            grid=(1,),
            in_specs=[_full_spec(a.shape) for a in args],
            out_specs=_full_spec((n, c_out, l2))),
        compiler_params=pltpu.CompilerParams(
            dimension_semantics=("arbitrary",)),
    )(*args)


# ---------------------------------------------------------------------------
# pure-JAX reference (identical math, f32) for the correctness check
# ---------------------------------------------------------------------------
def ref_up(x1_ncl, x2_ncl, params):
    w1, b1, g1, be1, w2, b2, g2, be2 = params
    _, _, l1 = x1_ncl.shape
    _, _, l2 = x2_ncl.shape
    l_up = 2 * l1
    j = jnp.arange(l_up)
    pos = j * (l1 - 1) / (l_up - 1) if l_up > 1 else jnp.zeros((l_up,))
    i0 = jnp.floor(pos).astype(jnp.int32)
    i1 = jnp.minimum(i0 + 1, l1 - 1)
    w_hi = (pos - i0).astype(jnp.float32)
    x1_up = x1_ncl[:, :, i0] * (1.0 - w_hi) + x1_ncl[:, :, i1] * w_hi
    diff = l2 - l_up
    x1_up = jnp.pad(x1_up, ((0, 0), (0, 0), (diff // 2, diff - diff // 2)))
    x = jnp.concatenate([x2_ncl, x1_up], axis=1)           # (N, C2+C1, L2)
    h = jnp.transpose(x, (0, 2, 1))                        # NLC

    def block(h, w, b, g, be):
        _, l, _ = h.shape
        hp = jnp.pad(h, ((0, 0), (1, 1), (0, 0)))
        y = sum(jnp.einsum('nlc,cd->nld', hp[:, k:k + l, :], w[k])
                for k in range(3)) + b[None]
        mu = y.mean(axis=(0, 1), keepdims=True)
        var = ((y - mu) ** 2).mean(axis=(0, 1), keepdims=True)
        y = (y - mu) / jnp.sqrt(var + EPS) * g[None] + be[None]
        return jnp.maximum(y, 0.0)

    h = block(h, w1, b1, g1, be1)
    h = block(h, w2, b2, g2, be2)
    return jnp.transpose(h, (0, 2, 1))


def make_params(key, c_in, c_out):
    ks = jax.random.split(key, 8)
    w1 = 0.2 * jax.random.normal(ks[0], (3, c_in, c_out), jnp.float32)
    b1 = 0.1 * jax.random.normal(ks[1], (1, c_out), jnp.float32)
    g1 = 1.0 + 0.1 * jax.random.normal(ks[2], (1, c_out), jnp.float32)
    be1 = 0.1 * jax.random.normal(ks[3], (1, c_out), jnp.float32)
    w2 = 0.2 * jax.random.normal(ks[4], (3, c_out, c_out), jnp.float32)
    b2 = 0.1 * jax.random.normal(ks[5], (1, c_out), jnp.float32)
    g2 = 1.0 + 0.1 * jax.random.normal(ks[6], (1, c_out), jnp.float32)
    be2 = 0.1 * jax.random.normal(ks[7], (1, c_out), jnp.float32)
    return (w1, b1, g1, be1, w2, b2, g2, be2)


if __name__ == "__main__":
    key = jax.random.PRNGKey(0)
    k1, k2, kp = jax.random.split(key, 3)

    # Up(in_channels=8, out_channels=8, bilinear=True):
    #   x1: deep feature (N, 4, 8) -> upsampled 2x;  x2: skip (N, 4, 16)
    N, C1, C2, C_OUT, L1, L2 = 2, 4, 4, 8, 8, 16
    x1 = jax.random.normal(k1, (N, C1, L1), jnp.float32)
    x2 = jax.random.normal(k2, (N, C2, L2), jnp.float32)
    params = make_params(kp, C1 + C2, C_OUT)

    out = jax.block_until_ready(up_forward(x1, x2, params))
    ref = jax.block_until_ready(ref_up(x1, x2, params))

    assert out.shape == (N, C_OUT, L2), out.shape
    err = float(jnp.max(jnp.abs(out - ref)))
    # tolerance sized for the bf16 MXU matmuls (f32 accumulation, f32 BN stats)
    assert jnp.allclose(out, ref, atol=5e-2, rtol=5e-2), err
    print("KERNEL_OK")
</pallas_src>

<mosaic_0001>
module attributes {stable_mosaic.version = 11 : i64} {
  func.func @_up_kernel(%arg0: i32, %arg1: memref<8x16xbf16, #tpu.memory_space<vmem>>, %arg2: memref<2x4x8xf32, #tpu.memory_space<vmem>>, %arg3: memref<2x4x16xf32, #tpu.memory_space<vmem>>, %arg4: memref<8x4xbf16, #tpu.memory_space<vmem>>, %arg5: memref<8x4xbf16, #tpu.memory_space<vmem>>, %arg6: memref<8x4xbf16, #tpu.memory_space<vmem>>, %arg7: memref<8x4xbf16, #tpu.memory_space<vmem>>, %arg8: memref<8x4xbf16, #tpu.memory_space<vmem>>, %arg9: memref<8x4xbf16, #tpu.memory_space<vmem>>, %arg10: memref<8x1xf32, #tpu.memory_space<vmem>>, %arg11: memref<8x1xf32, #tpu.memory_space<vmem>>, %arg12: memref<8x1xf32, #tpu.memory_space<vmem>>, %arg13: memref<8x8xbf16, #tpu.memory_space<vmem>>, %arg14: memref<8x8xbf16, #tpu.memory_space<vmem>>, %arg15: memref<8x8xbf16, #tpu.memory_space<vmem>>, %arg16: memref<8x1xf32, #tpu.memory_space<vmem>>, %arg17: memref<8x1xf32, #tpu.memory_space<vmem>>, %arg18: memref<8x1xf32, #tpu.memory_space<vmem>>, %arg19: memref<2x8x16xf32, #tpu.memory_space<vmem>>) attributes {dimension_semantics = [#tpu.dimension_semantics<arbitrary>], iteration_bounds = array<i64: 1>, scalar_prefetch = 0 : i64, scratch_operands = 0 : i64, tpu.core_type = #tpu.core_type<tc>, window_params = [{pipeline_mode = #tpu.pipeline_mode<synchronous>, transform_indices = @transform_0, window_bounds = array<i64: 8, 16>}, {pipeline_mode = #tpu.pipeline_mode<synchronous>, transform_indices = @transform_1, window_bounds = array<i64: 2, 4, 8>}, {pipeline_mode = #tpu.pipeline_mode<synchronous>, transform_indices = @transform_2, window_bounds = array<i64: 2, 4, 16>}, {pipeline_mode = #tpu.pipeline_mode<synchronous>, transform_indices = @transform_3, window_bounds = array<i64: 8, 4>}, {pipeline_mode = #tpu.pipeline_mode<synchronous>, transform_indices = @transform_4, window_bounds = array<i64: 8, 4>}, {pipeline_mode = #tpu.pipeline_mode<synchronous>, transform_indices = @transform_5, window_bounds = array<i64: 8, 4>}, {pipeline_mode = #tpu.pipeline_mode<synchronous>, transform_indices = @transform_6, window_bounds = array<i64: 8, 4>}, {pipeline_mode = #tpu.pipeline_mode<synchronous>, transform_indices = @transform_7, window_bounds = array<i64: 8, 4>}, {pipeline_mode = #tpu.pipeline_mode<synchronous>, transform_indices = @transform_8, window_bounds = array<i64: 8, 4>}, {pipeline_mode = #tpu.pipeline_mode<synchronous>, transform_indices = @transform_9, window_bounds = array<i64: 8, 1>}, {pipeline_mode = #tpu.pipeline_mode<synchronous>, transform_indices = @transform_10, window_bounds = array<i64: 8, 1>}, {pipeline_mode = #tpu.pipeline_mode<synchronous>, transform_indices = @transform_11, window_bounds = array<i64: 8, 1>}, {pipeline_mode = #tpu.pipeline_mode<synchronous>, transform_indices = @transform_12, window_bounds = array<i64: 8, 8>}, {pipeline_mode = #tpu.pipeline_mode<synchronous>, transform_indices = @transform_13, window_bounds = array<i64: 8, 8>}, {pipeline_mode = #tpu.pipeline_mode<synchronous>, transform_indices = @transform_14, window_bounds = array<i64: 8, 8>}, {pipeline_mode = #tpu.pipeline_mode<synchronous>, transform_indices = @transform_15, window_bounds = array<i64: 8, 1>}, {pipeline_mode = #tpu.pipeline_mode<synchronous>, transform_indices = @transform_16, window_bounds = array<i64: 8, 1>}, {pipeline_mode = #tpu.pipeline_mode<synchronous>, transform_indices = @transform_17, window_bounds = array<i64: 8, 1>}, {pipeline_mode = #tpu.pipeline_mode<synchronous>, transform_indices = @transform_18, window_bounds = array<i64: 2, 8, 16>}]} {
    %c0 = arith.constant 0 : index
    %c0_0 = arith.constant 0 : index
    %0 = vector.load %arg1[%c0, %c0_0] : memref<8x16xbf16, #tpu.memory_space<vmem>>, vector<8x16xbf16>
    %cst = arith.constant 0.000000e+00 : f32
    %1 = vector.broadcast %cst : f32 to vector<8x1xf32>
    %cst_1 = arith.constant 0.000000e+00 : f32
    %2 = vector.broadcast %cst_1 : f32 to vector<8x1xf32>
    %c0_2 = arith.constant 0 : index
    %c0_3 = arith.constant 0 : index
    %c0_4 = arith.constant 0 : index
    %3 = vector.load %arg2[%c0_2, %c0_3, %c0_4] : memref<2x4x8xf32, #tpu.memory_space<vmem>>, vector<1x4x8xf32>
    %4 = vector.shape_cast %3 : vector<1x4x8xf32> to vector<4x8xf32>
    %5 = arith.truncf %4 : vector<4x8xf32> to vector<4x8xbf16>
    %cst_5 = arith.constant dense<0.000000e+00> : vector<4x16xf32>
    %6 = tpu.matmul %5, %0, %cst_5 {dimension_numbers = #tpu.dot_dimension_numbers<[1], [0], [0], [1], [0, 0, 1, 1], [], []>} : vector<4x8xbf16>, vector<8x16xbf16>, vector<4x16xf32> -> vector<4x16xf32>
    %c0_6 = arith.constant 0 : index
    %c0_7 = arith.constant 0 : index
    %c0_8 = arith.constant 0 : index
    %7 = vector.load %arg3[%c0_6, %c0_7, %c0_8] : memref<2x4x16xf32, #tpu.memory_space<vmem>>, vector<1x4x16xf32>
    %8 = vector.shape_cast %7 : vector<1x4x16xf32> to vector<4x16xf32>
    %9 = tpu.iota {dimensions = array<i32: 1>} : vector<4x16xi32>
    %c0_i32 = arith.constant 0 : i32
    %10 = vector.broadcast %c0_i32 : i32 to vector<4x16xi32>
    %11 = arith.cmpi eq, %9, %10 : vector<4x16xi32>
    %c1_i32 = arith.constant 1 : i32
    %12 = tpu.dynamic_rotate %8 by %c1_i32 dim 1 : vector<4x16xf32>, i32 -> vector<4x16xf32>
    %cst_9 = arith.constant 0.000000e+00 : f32
    %13 = vector.broadcast %cst_9 : f32 to vector<4x16xf32>
    %14 = arith.select %11, %13, %12 : vector<4x16xi1>, vector<4x16xf32>
    %c15_i32 = arith.constant 15 : i32
    %15 = vector.broadcast %c15_i32 : i32 to vector<4x16xi32>
    %16 = arith.cmpi eq, %9, %15 : vector<4x16xi32>
    %c15_i32_10 = arith.constant 15 : i32
    %17 = tpu.dynamic_rotate %8 by %c15_i32_10 dim 1 : vector<4x16xf32>, i32 -> vector<4x16xf32>
    %cst_11 = arith.constant 0.000000e+00 : f32
    %18 = vector.broadcast %cst_11 : f32 to vector<4x16xf32>
    %19 = arith.select %16, %18, %17 : vector<4x16xi1>, vector<4x16xf32>
    %c0_12 = arith.constant 0 : index
    %c0_13 = arith.constant 0 : index
    %20 = vector.load %arg5[%c0_12, %c0_13] : memref<8x4xbf16, #tpu.memory_space<vmem>>, vector<8x4xbf16>
    %21 = arith.truncf %8 : vector<4x16xf32> to vector<4x16xbf16>
    %cst_14 = arith.constant dense<0.000000e+00> : vector<8x16xf32>
    %22 = tpu.matmul %20, %21, %cst_14 {dimension_numbers = #tpu.dot_dimension_numbers<[1], [0], [0], [1], [0, 0, 1, 1], [], []>} : vector<8x4xbf16>, vector<4x16xbf16>, vector<8x16xf32> -> vector<8x16xf32>
    %c0_15 = arith.constant 0 : index
    %c0_16 = arith.constant 0 : index
    %23 = vector.load %arg4[%c0_15, %c0_16] : memref<8x4xbf16, #tpu.memory_space<vmem>>, vector<8x4xbf16>
    %24 = arith.truncf %14 : vector<4x16xf32> to vector<4x16xbf16>
    %cst_17 = arith.constant dense<0.000000e+00> : vector<8x16xf32>
    %25 = tpu.matmul %23, %24, %cst_17 {dimension_numbers = #tpu.dot_dimension_numbers<[1], [0], [0], [1], [0, 0, 1, 1], [], []>} : vector<8x4xbf16>, vector<4x16xbf16>, vector<8x16xf32> -> vector<8x16xf32>
    %26 = arith.addf %22, %25 : vector<8x16xf32>
    %c0_18 = arith.constant 0 : index
    %c0_19 = arith.constant 0 : index
    %27 = vector.load %arg6[%c0_18, %c0_19] : memref<8x4xbf16, #tpu.memory_space<vmem>>, vector<8x4xbf16>
    %28 = arith.truncf %19 : vector<4x16xf32> to vector<4x16xbf16>
    %cst_20 = arith.constant dense<0.000000e+00> : vector<8x16xf32>
    %29 = tpu.matmul %27, %28, %cst_20 {dimension_numbers = #tpu.dot_dimension_numbers<[1], [0], [0], [1], [0, 0, 1, 1], [], []>} : vector<8x4xbf16>, vector<4x16xbf16>, vector<8x16xf32> -> vector<8x16xf32>
    %30 = arith.addf %26, %29 : vector<8x16xf32>
    %31 = tpu.iota {dimensions = array<i32: 1>} : vector<4x16xi32>
    %c0_i32_21 = arith.constant 0 : i32
    %32 = vector.broadcast %c0_i32_21 : i32 to vector<4x16xi32>
    %33 = arith.cmpi eq, %31, %32 : vector<4x16xi32>
    %c1_i32_22 = arith.constant 1 : i32
    %34 = tpu.dynamic_rotate %6 by %c1_i32_22 dim 1 : vector<4x16xf32>, i32 -> vector<4x16xf32>
    %cst_23 = arith.constant 0.000000e+00 : f32
    %35 = vector.broadcast %cst_23 : f32 to vector<4x16xf32>
    %36 = arith.select %33, %35, %34 : vector<4x16xi1>, vector<4x16xf32>
    %c15_i32_24 = arith.constant 15 : i32
    %37 = vector.broadcast %c15_i32_24 : i32 to vector<4x16xi32>
    %38 = arith.cmpi eq, %31, %37 : vector<4x16xi32>
    %c15_i32_25 = arith.constant 15 : i32
    %39 = tpu.dynamic_rotate %6 by %c15_i32_25 dim 1 : vector<4x16xf32>, i32 -> vector<4x16xf32>
    %cst_26 = arith.constant 0.000000e+00 : f32
    %40 = vector.broadcast %cst_26 : f32 to vector<4x16xf32>
    %41 = arith.select %38, %40, %39 : vector<4x16xi1>, vector<4x16xf32>
    %c0_27 = arith.constant 0 : index
    %c0_28 = arith.constant 0 : index
    %42 = vector.load %arg8[%c0_27, %c0_28] : memref<8x4xbf16, #tpu.memory_space<vmem>>, vector<8x4xbf16>
    %43 = arith.truncf %6 : vector<4x16xf32> to vector<4x16xbf16>
    %cst_29 = arith.constant dense<0.000000e+00> : vector<8x16xf32>
    %44 = tpu.matmul %42, %43, %cst_29 {dimension_numbers = #tpu.dot_dimension_numbers<[1], [0], [0], [1], [0, 0, 1, 1], [], []>} : vector<8x4xbf16>, vector<4x16xbf16>, vector<8x16xf32> -> vector<8x16xf32>
    %45 = arith.addf %44, %30 : vector<8x16xf32>
    %c0_30 = arith.constant 0 : index
    %c0_31 = arith.constant 0 : index
    %46 = vector.load %arg7[%c0_30, %c0_31] : memref<8x4xbf16, #tpu.memory_space<vmem>>, vector<8x4xbf16>
    %47 = arith.truncf %36 : vector<4x16xf32> to vector<4x16xbf16>
    %cst_32 = arith.constant dense<0.000000e+00> : vector<8x16xf32>
    %48 = tpu.matmul %46, %47, %cst_32 {dimension_numbers = #tpu.dot_dimension_numbers<[1], [0], [0], [1], [0, 0, 1, 1], [], []>} : vector<8x4xbf16>, vector<4x16xbf16>, vector<8x16xf32> -> vector<8x16xf32>
    %49 = arith.addf %45, %48 : vector<8x16xf32>
    %c0_33 = arith.constant 0 : index
    %c0_34 = arith.constant 0 : index
    %50 = vector.load %arg9[%c0_33, %c0_34] : memref<8x4xbf16, #tpu.memory_space<vmem>>, vector<8x4xbf16>
    %51 = arith.truncf %41 : vector<4x16xf32> to vector<4x16xbf16>
    %cst_35 = arith.constant dense<0.000000e+00> : vector<8x16xf32>
    %52 = tpu.matmul %50, %51, %cst_35 {dimension_numbers = #tpu.dot_dimension_numbers<[1], [0], [0], [1], [0, 0, 1, 1], [], []>} : vector<8x4xbf16>, vector<4x16xbf16>, vector<8x16xf32> -> vector<8x16xf32>
    %53 = arith.addf %49, %52 : vector<8x16xf32>
    %c0_36 = arith.constant 0 : index
    %c0_37 = arith.constant 0 : index
    %54 = vector.load %arg10[%c0_36, %c0_37] : memref<8x1xf32, #tpu.memory_space<vmem>>, vector<8x1xf32>
    %55 = vector.broadcast %54 : vector<8x1xf32> to vector<8x16xf32>
    %56 = arith.addf %53, %55 : vector<8x16xf32>
    %cst_38 = arith.constant dense<0.000000e+00> : vector<8xf32>
    %57 = vector.multi_reduction <add>, %56, %cst_38 [1] : vector<8x16xf32> to vector<8xf32>
    %58 = vector.shape_cast %57 : vector<8xf32> to vector<8x1xf32>
    %59 = arith.addf %1, %58 : vector<8x1xf32>
    %60 = arith.mulf %56, %56 : vector<8x16xf32>
    %cst_39 = arith.constant dense<0.000000e+00> : vector<8xf32>
    %61 = vector.multi_reduction <add>, %60, %cst_39 [1] : vector<8x16xf32> to vector<8xf32>
    %62 = vector.shape_cast %61 : vector<8xf32> to vector<8x1xf32>
    %63 = arith.addf %2, %62 : vector<8x1xf32>
    %c1 = arith.constant 1 : index
    %c0_40 = arith.constant 0 : index
    %c0_41 = arith.constant 0 : index
    %64 = vector.load %arg2[%c1, %c0_40, %c0_41] : memref<2x4x8xf32, #tpu.memory_space<vmem>>, vector<1x4x8xf32>
    %65 = vector.shape_cast %64 : vector<1x4x8xf32> to vector<4x8xf32>
    %66 = arith.truncf %65 : vector<4x8xf32> to vector<4x8xbf16>
    %cst_42 = arith.constant dense<0.000000e+00> : vector<4x16xf32>
    %67 = tpu.matmul %66, %0, %cst_42 {dimension_numbers = #tpu.dot_dimension_numbers<[1], [0], [0], [1], [0, 0, 1, 1], [], []>} : vector<4x8xbf16>, vector<8x16xbf16>, vector<4x16xf32> -> vector<4x16xf32>
    %c1_43 = arith.constant 1 : index
    %c0_44 = arith.constant 0 : index
    %c0_45 = arith.constant 0 : index
    %68 = vector.load %arg3[%c1_43, %c0_44, %c0_45] : memref<2x4x16xf32, #tpu.memory_space<vmem>>, vector<1x4x16xf32>
    %69 = vector.shape_cast %68 : vector<1x4x16xf32> to vector<4x16xf32>
    %70 = tpu.iota {dimensions = array<i32: 1>} : vector<4x16xi32>
    %c0_i32_46 = arith.constant 0 : i32
    %71 = vector.broadcast %c0_i32_46 : i32 to vector<4x16xi32>
    %72 = arith.cmpi eq, %70, %71 : vector<4x16xi32>
    %c1_i32_47 = arith.constant 1 : i32
    %73 = tpu.dynamic_rotate %69 by %c1_i32_47 dim 1 : vector<4x16xf32>, i32 -> vector<4x16xf32>
    %cst_48 = arith.constant 0.000000e+00 : f32
    %74 = vector.broadcast %cst_48 : f32 to vector<4x16xf32>
    %75 = arith.select %72, %74, %73 : vector<4x16xi1>, vector<4x16xf32>
    %c15_i32_49 = arith.constant 15 : i32
    %76 = vector.broadcast %c15_i32_49 : i32 to vector<4x16xi32>
    %77 = arith.cmpi eq, %70, %76 : vector<4x16xi32>
    %c15_i32_50 = arith.constant 15 : i32
    %78 = tpu.dynamic_rotate %69 by %c15_i32_50 dim 1 : vector<4x16xf32>, i32 -> vector<4x16xf32>
    %cst_51 = arith.constant 0.000000e+00 : f32
    %79 = vector.broadcast %cst_51 : f32 to vector<4x16xf32>
    %80 = arith.select %77, %79, %78 : vector<4x16xi1>, vector<4x16xf32>
    %c0_52 = arith.constant 0 : index
    %c0_53 = arith.constant 0 : index
    %81 = vector.load %arg5[%c0_52, %c0_53] : memref<8x4xbf16, #tpu.memory_space<vmem>>, vector<8x4xbf16>
    %82 = arith.truncf %69 : vector<4x16xf32> to vector<4x16xbf16>
    %cst_54 = arith.constant dense<0.000000e+00> : vector<8x16xf32>
    %83 = tpu.matmul %81, %82, %cst_54 {dimension_numbers = #tpu.dot_dimension_numbers<[1], [0], [0], [1], [0, 0, 1, 1], [], []>} : vector<8x4xbf16>, vector<4x16xbf16>, vector<8x16xf32> -> vector<8x16xf32>
    %c0_55 = arith.constant 0 : index
    %c0_56 = arith.constant 0 : index
    %84 = vector.load %arg4[%c0_55, %c0_56] : memref<8x4xbf16, #tpu.memory_space<vmem>>, vector<8x4xbf16>
    %85 = arith.truncf %75 : vector<4x16xf32> to vector<4x16xbf16>
    %cst_57 = arith.constant dense<0.000000e+00> : vector<8x16xf32>
    %86 = tpu.matmul %84, %85, %cst_57 {dimension_numbers = #tpu.dot_dimension_numbers<[1], [0], [0], [1], [0, 0, 1, 1], [], []>} : vector<8x4xbf16>, vector<4x16xbf16>, vector<8x16xf32> -> vector<8x16xf32>
    %87 = arith.addf %83, %86 : vector<8x16xf32>
    %c0_58 = arith.constant 0 : index
    %c0_59 = arith.constant 0 : index
    %88 = vector.load %arg6[%c0_58, %c0_59] : memref<8x4xbf16, #tpu.memory_space<vmem>>, vector<8x4xbf16>
    %89 = arith.truncf %80 : vector<4x16xf32> to vector<4x16xbf16>
    %cst_60 = arith.constant dense<0.000000e+00> : vector<8x16xf32>
    %90 = tpu.matmul %88, %89, %cst_60 {dimension_numbers = #tpu.dot_dimension_numbers<[1], [0], [0], [1], [0, 0, 1, 1], [], []>} : vector<8x4xbf16>, vector<4x16xbf16>, vector<8x16xf32> -> vector<8x16xf32>
    %91 = arith.addf %87, %90 : vector<8x16xf32>
    %92 = tpu.iota {dimensions = array<i32: 1>} : vector<4x16xi32>
    %c0_i32_61 = arith.constant 0 : i32
    %93 = vector.broadcast %c0_i32_61 : i32 to vector<4x16xi32>
    %94 = arith.cmpi eq, %92, %93 : vector<4x16xi32>
    %c1_i32_62 = arith.constant 1 : i32
    %95 = tpu.dynamic_rotate %67 by %c1_i32_62 dim 1 : vector<4x16xf32>, i32 -> vector<4x16xf32>
    %cst_63 = arith.constant 0.000000e+00 : f32
    %96 = vector.broadcast %cst_63 : f32 to vector<4x16xf32>
    %97 = arith.select %94, %96, %95 : vector<4x16xi1>, vector<4x16xf32>
    %c15_i32_64 = arith.constant 15 : i32
    %98 = vector.broadcast %c15_i32_64 : i32 to vector<4x16xi32>
    %99 = arith.cmpi eq, %92, %98 : vector<4x16xi32>
    %c15_i32_65 = arith.constant 15 : i32
    %100 = tpu.dynamic_rotate %67 by %c15_i32_65 dim 1 : vector<4x16xf32>, i32 -> vector<4x16xf32>
    %cst_66 = arith.constant 0.000000e+00 : f32
    %101 = vector.broadcast %cst_66 : f32 to vector<4x16xf32>
    %102 = arith.select %99, %101, %100 : vector<4x16xi1>, vector<4x16xf32>
    %c0_67 = arith.constant 0 : index
    %c0_68 = arith.constant 0 : index
    %103 = vector.load %arg8[%c0_67, %c0_68] : memref<8x4xbf16, #tpu.memory_space<vmem>>, vector<8x4xbf16>
    %104 = arith.truncf %67 : vector<4x16xf32> to vector<4x16xbf16>
    %cst_69 = arith.constant dense<0.000000e+00> : vector<8x16xf32>
    %105 = tpu.matmul %103, %104, %cst_69 {dimension_numbers = #tpu.dot_dimension_numbers<[1], [0], [0], [1], [0, 0, 1, 1], [], []>} : vector<8x4xbf16>, vector<4x16xbf16>, vector<8x16xf32> -> vector<8x16xf32>
    %106 = arith.addf %105, %91 : vector<8x16xf32>
    %c0_70 = arith.constant 0 : index
    %c0_71 = arith.constant 0 : index
    %107 = vector.load %arg7[%c0_70, %c0_71] : memref<8x4xbf16, #tpu.memory_space<vmem>>, vector<8x4xbf16>
    %108 = arith.truncf %97 : vector<4x16xf32> to vector<4x16xbf16>
    %cst_72 = arith.constant dense<0.000000e+00> : vector<8x16xf32>
    %109 = tpu.matmul %107, %108, %cst_72 {dimension_numbers = #tpu.dot_dimension_numbers<[1], [0], [0], [1], [0, 0, 1, 1], [], []>} : vector<8x4xbf16>, vector<4x16xbf16>, vector<8x16xf32> -> vector<8x16xf32>
    %110 = arith.addf %106, %109 : vector<8x16xf32>
    %c0_73 = arith.constant 0 : index
    %c0_74 = arith.constant 0 : index
    %111 = vector.load %arg9[%c0_73, %c0_74] : memref<8x4xbf16, #tpu.memory_space<vmem>>, vector<8x4xbf16>
    %112 = arith.truncf %102 : vector<4x16xf32> to vector<4x16xbf16>
    %cst_75 = arith.constant dense<0.000000e+00> : vector<8x16xf32>
    %113 = tpu.matmul %111, %112, %cst_75 {dimension_numbers = #tpu.dot_dimension_numbers<[1], [0], [0], [1], [0, 0, 1, 1], [], []>} : vector<8x4xbf16>, vector<4x16xbf16>, vector<8x16xf32> -> vector<8x16xf32>
    %114 = arith.addf %110, %113 : vector<8x16xf32>
    %c0_76 = arith.constant 0 : index
    %c0_77 = arith.constant 0 : index
    %115 = vector.load %arg10[%c0_76, %c0_77] : memref<8x1xf32, #tpu.memory_space<vmem>>, vector<8x1xf32>
    %116 = vector.broadcast %115 : vector<8x1xf32> to vector<8x16xf32>
    %117 = arith.addf %114, %116 : vector<8x16xf32>
    %cst_78 = arith.constant dense<0.000000e+00> : vector<8xf32>
    %118 = vector.multi_reduction <add>, %117, %cst_78 [1] : vector<8x16xf32> to vector<8xf32>
    %119 = vector.shape_cast %118 : vector<8xf32> to vector<8x1xf32>
    %120 = arith.addf %59, %119 : vector<8x1xf32>
    %121 = arith.mulf %117, %117 : vector<8x16xf32>
    %cst_79 = arith.constant dense<0.000000e+00> : vector<8xf32>
    %122 = vector.multi_reduction <add>, %121, %cst_79 [1] : vector<8x16xf32> to vector<8xf32>
    %123 = vector.shape_cast %122 : vector<8xf32> to vector<8x1xf32>
    %124 = arith.addf %63, %123 : vector<8x1xf32>
    %c0_80 = arith.constant 0 : index
    %c0_81 = arith.constant 0 : index
    %125 = vector.load %arg11[%c0_80, %c0_81] : memref<8x1xf32, #tpu.memory_space<vmem>>, vector<8x1xf32>
    %c0_82 = arith.constant 0 : index
    %c0_83 = arith.constant 0 : index
    %126 = vector.load %arg12[%c0_82, %c0_83] : memref<8x1xf32, #tpu.memory_space<vmem>>, vector<8x1xf32>
    %cst_84 = arith.constant 3.125000e-02 : f32
    %127 = vector.broadcast %cst_84 : f32 to vector<8x1xf32>
    %128 = arith.mulf %120, %127 : vector<8x1xf32>
    %cst_85 = arith.constant 3.125000e-02 : f32
    %129 = vector.broadcast %cst_85 : f32 to vector<8x1xf32>
    %130 = arith.mulf %124, %129 : vector<8x1xf32>
    %131 = arith.mulf %128, %128 : vector<8x1xf32>
    %132 = arith.subf %130, %131 : vector<8x1xf32>
    %cst_86 = arith.constant 0.000000e+00 : f32
    %133 = vector.broadcast %cst_86 : f32 to vector<8x1xf32>
    %134 = arith.maximumf %132, %133 : vector<8x1xf32>
    %cst_87 = arith.constant 9.99999974E-6 : f32
    %135 = vector.broadcast %cst_87 : f32 to vector<8x1xf32>
    %136 = arith.addf %134, %135 : vector<8x1xf32>
    %137 = math.rsqrt %136 : vector<8x1xf32>
    %138 = arith.mulf %125, %137 : vector<8x1xf32>
    %139 = arith.mulf %128, %138 : vector<8x1xf32>
    %140 = arith.subf %126, %139 : vector<8x1xf32>
    %cst_88 = arith.constant 0.000000e+00 : f32
    %141 = vector.broadcast %cst_88 : f32 to vector<8x1xf32>
    %cst_89 = arith.constant 0.000000e+00 : f32
    %142 = vector.broadcast %cst_89 : f32 to vector<8x1xf32>
    %143 = vector.broadcast %138 : vector<8x1xf32> to vector<8x16xf32>
    %144 = arith.mulf %56, %143 : vector<8x16xf32>
    %145 = vector.broadcast %140 : vector<8x1xf32> to vector<8x16xf32>
    %146 = arith.addf %144, %145 : vector<8x16xf32>
    %cst_90 = arith.constant 0.000000e+00 : f32
    %147 = vector.broadcast %cst_90 : f32 to vector<8x16xf32>
    %148 = arith.maximumf %146, %147 : vector<8x16xf32>
    %149 = tpu.iota {dimensions = array<i32: 1>} : vector<8x16xi32>
    %c0_i32_91 = arith.constant 0 : i32
    %150 = vector.broadcast %c0_i32_91 : i32 to vector<8x16xi32>
    %151 = arith.cmpi eq, %149, %150 : vector<8x16xi32>
    %c1_i32_92 = arith.constant 1 : i32
    %152 = tpu.dynamic_rotate %148 by %c1_i32_92 dim 1 : vector<8x16xf32>, i32 -> vector<8x16xf32>
    %cst_93 = arith.constant 0.000000e+00 : f32
    %153 = vector.broadcast %cst_93 : f32 to vector<8x16xf32>
    %154 = arith.select %151, %153, %152 : vector<8x16xi1>, vector<8x16xf32>
    %c15_i32_94 = arith.constant 15 : i32
    %155 = vector.broadcast %c15_i32_94 : i32 to vector<8x16xi32>
    %156 = arith.cmpi eq, %149, %155 : vector<8x16xi32>
    %c15_i32_95 = arith.constant 15 : i32
    %157 = tpu.dynamic_rotate %148 by %c15_i32_95 dim 1 : vector<8x16xf32>, i32 -> vector<8x16xf32>
    %cst_96 = arith.constant 0.000000e+00 : f32
    %158 = vector.broadcast %cst_96 : f32 to vector<8x16xf32>
    %159 = arith.select %156, %158, %157 : vector<8x16xi1>, vector<8x16xf32>
    %c0_97 = arith.constant 0 : index
    %c0_98 = arith.constant 0 : index
    %160 = vector.load %arg14[%c0_97, %c0_98] : memref<8x8xbf16, #tpu.memory_space<vmem>>, vector<8x8xbf16>
    %161 = arith.truncf %148 : vector<8x16xf32> to vector<8x16xbf16>
    %cst_99 = arith.constant dense<0.000000e+00> : vector<8x16xf32>
    %162 = tpu.matmul %160, %161, %cst_99 {dimension_numbers = #tpu.dot_dimension_numbers<[1], [0], [0], [1], [0, 0, 1, 1], [], []>} : vector<8x8xbf16>, vector<8x16xbf16>, vector<8x16xf32> -> vector<8x16xf32>
    %c0_100 = arith.constant 0 : index
    %c0_101 = arith.constant 0 : index
    %163 = vector.load %arg13[%c0_100, %c0_101] : memref<8x8xbf16, #tpu.memory_space<vmem>>, vector<8x8xbf16>
    %164 = arith.truncf %154 : vector<8x16xf32> to vector<8x16xbf16>
    %cst_102 = arith.constant dense<0.000000e+00> : vector<8x16xf32>
    %165 = tpu.matmul %163, %164, %cst_102 {dimension_numbers = #tpu.dot_dimension_numbers<[1], [0], [0], [1], [0, 0, 1, 1], [], []>} : vector<8x8xbf16>, vector<8x16xbf16>, vector<8x16xf32> -> vector<8x16xf32>
    %166 = arith.addf %162, %165 : vector<8x16xf32>
    %c0_103 = arith.constant 0 : index
    %c0_104 = arith.constant 0 : index
    %167 = vector.load %arg15[%c0_103, %c0_104] : memref<8x8xbf16, #tpu.memory_space<vmem>>, vector<8x8xbf16>
    %168 = arith.truncf %159 : vector<8x16xf32> to vector<8x16xbf16>
    %cst_105 = arith.constant dense<0.000000e+00> : vector<8x16xf32>
    %169 = tpu.matmul %167, %168, %cst_105 {dimension_numbers = #tpu.dot_dimension_numbers<[1], [0], [0], [1], [0, 0, 1, 1], [], []>} : vector<8x8xbf16>, vector<8x16xbf16>, vector<8x16xf32> -> vector<8x16xf32>
    %170 = arith.addf %166, %169 : vector<8x16xf32>
    %c0_106 = arith.constant 0 : index
    %c0_107 = arith.constant 0 : index
    %171 = vector.load %arg16[%c0_106, %c0_107] : memref<8x1xf32, #tpu.memory_space<vmem>>, vector<8x1xf32>
    %172 = vector.broadcast %171 : vector<8x1xf32> to vector<8x16xf32>
    %173 = arith.addf %170, %172 : vector<8x16xf32>
    %cst_108 = arith.constant dense<0.000000e+00> : vector<8xf32>
    %174 = vector.multi_reduction <add>, %173, %cst_108 [1] : vector<8x16xf32> to vector<8xf32>
    %175 = vector.shape_cast %174 : vector<8xf32> to vector<8x1xf32>
    %176 = arith.addf %141, %175 : vector<8x1xf32>
    %177 = arith.mulf %173, %173 : vector<8x16xf32>
    %cst_109 = arith.constant dense<0.000000e+00> : vector<8xf32>
    %178 = vector.multi_reduction <add>, %177, %cst_109 [1] : vector<8x16xf32> to vector<8xf32>
    %179 = vector.shape_cast %178 : vector<8xf32> to vector<8x1xf32>
    %180 = arith.addf %142, %179 : vector<8x1xf32>
    %181 = vector.broadcast %138 : vector<8x1xf32> to vector<8x16xf32>
    %182 = arith.mulf %117, %181 : vector<8x16xf32>
    %183 = vector.broadcast %140 : vector<8x1xf32> to vector<8x16xf32>
    %184 = arith.addf %182, %183 : vector<8x16xf32>
    %cst_110 = arith.constant 0.000000e+00 : f32
    %185 = vector.broadcast %cst_110 : f32 to vector<8x16xf32>
    %186 = arith.maximumf %184, %185 : vector<8x16xf32>
    %187 = tpu.iota {dimensions = array<i32: 1>} : vector<8x16xi32>
    %c0_i32_111 = arith.constant 0 : i32
    %188 = vector.broadcast %c0_i32_111 : i32 to vector<8x16xi32>
    %189 = arith.cmpi eq, %187, %188 : vector<8x16xi32>
    %c1_i32_112 = arith.constant 1 : i32
    %190 = tpu.dynamic_rotate %186 by %c1_i32_112 dim 1 : vector<8x16xf32>, i32 -> vector<8x16xf32>
    %cst_113 = arith.constant 0.000000e+00 : f32
    %191 = vector.broadcast %cst_113 : f32 to vector<8x16xf32>
    %192 = arith.select %189, %191, %190 : vector<8x16xi1>, vector<8x16xf32>
    %c15_i32_114 = arith.constant 15 : i32
    %193 = vector.broadcast %c15_i32_114 : i32 to vector<8x16xi32>
    %194 = arith.cmpi eq, %187, %193 : vector<8x16xi32>
    %c15_i32_115 = arith.constant 15 : i32
    %195 = tpu.dynamic_rotate %186 by %c15_i32_115 dim 1 : vector<8x16xf32>, i32 -> vector<8x16xf32>
    %cst_116 = arith.constant 0.000000e+00 : f32
    %196 = vector.broadcast %cst_116 : f32 to vector<8x16xf32>
    %197 = arith.select %194, %196, %195 : vector<8x16xi1>, vector<8x16xf32>
    %c0_117 = arith.constant 0 : index
    %c0_118 = arith.constant 0 : index
    %198 = vector.load %arg14[%c0_117, %c0_118] : memref<8x8xbf16, #tpu.memory_space<vmem>>, vector<8x8xbf16>
    %199 = arith.truncf %186 : vector<8x16xf32> to vector<8x16xbf16>
    %cst_119 = arith.constant dense<0.000000e+00> : vector<8x16xf32>
    %200 = tpu.matmul %198, %199, %cst_119 {dimension_numbers = #tpu.dot_dimension_numbers<[1], [0], [0], [1], [0, 0, 1, 1], [], []>} : vector<8x8xbf16>, vector<8x16xbf16>, vector<8x16xf32> -> vector<8x16xf32>
    %c0_120 = arith.constant 0 : index
    %c0_121 = arith.constant 0 : index
    %201 = vector.load %arg13[%c0_120, %c0_121] : memref<8x8xbf16, #tpu.memory_space<vmem>>, vector<8x8xbf16>
    %202 = arith.truncf %192 : vector<8x16xf32> to vector<8x16xbf16>
    %cst_122 = arith.constant dense<0.000000e+00> : vector<8x16xf32>
    %203 = tpu.matmul %201, %202, %cst_122 {dimension_numbers = #tpu.dot_dimension_numbers<[1], [0], [0], [1], [0, 0, 1, 1], [], []>} : vector<8x8xbf16>, vector<8x16xbf16>, vector<8x16xf32> -> vector<8x16xf32>
    %204 = arith.addf %200, %203 : vector<8x16xf32>
    %c0_123 = arith.constant 0 : index
    %c0_124 = arith.constant 0 : index
    %205 = vector.load %arg15[%c0_123, %c0_124] : memref<8x8xbf16, #tpu.memory_space<vmem>>, vector<8x8xbf16>
    %206 = arith.truncf %197 : vector<8x16xf32> to vector<8x16xbf16>
    %cst_125 = arith.constant dense<0.000000e+00> : vector<8x16xf32>
    %207 = tpu.matmul %205, %206, %cst_125 {dimension_numbers = #tpu.dot_dimension_numbers<[1], [0], [0], [1], [0, 0, 1, 1], [], []>} : vector<8x8xbf16>, vector<8x16xbf16>, vector<8x16xf32> -> vector<8x16xf32>
    %208 = arith.addf %204, %207 : vector<8x16xf32>
    %c0_126 = arith.constant 0 : index
    %c0_127 = arith.constant 0 : index
    %209 = vector.load %arg16[%c0_126, %c0_127] : memref<8x1xf32, #tpu.memory_space<vmem>>, vector<8x1xf32>
    %210 = vector.broadcast %209 : vector<8x1xf32> to vector<8x16xf32>
    %211 = arith.addf %208, %210 : vector<8x16xf32>
    %cst_128 = arith.constant dense<0.000000e+00> : vector<8xf32>
    %212 = vector.multi_reduction <add>, %211, %cst_128 [1] : vector<8x16xf32> to vector<8xf32>
    %213 = vector.shape_cast %212 : vector<8xf32> to vector<8x1xf32>
    %214 = arith.addf %176, %213 : vector<8x1xf32>
    %215 = arith.mulf %211, %211 : vector<8x16xf32>
    %cst_129 = arith.constant dense<0.000000e+00> : vector<8xf32>
    %216 = vector.multi_reduction <add>, %215, %cst_129 [1] : vector<8x16xf32> to vector<8xf32>
    %217 = vector.shape_cast %216 : vector<8xf32> to vector<8x1xf32>
    %218 = arith.addf %180, %217 : vector<8x1xf32>
    %c0_130 = arith.constant 0 : index
    %c0_131 = arith.constant 0 : index
    %219 = vector.load %arg17[%c0_130, %c0_131] : memref<8x1xf32, #tpu.memory_space<vmem>>, vector<8x1xf32>
    %c0_132 = arith.constant 0 : index
    %c0_133 = arith.constant 0 : index
    %220 = vector.load %arg18[%c0_132, %c0_133] : memref<8x1xf32, #tpu.memory_space<vmem>>, vector<8x1xf32>
    %cst_134 = arith.constant 3.125000e-02 : f32
    %221 = vector.broadcast %cst_134 : f32 to vector<8x1xf32>
    %222 = arith.mulf %214, %221 : vector<8x1xf32>
    %cst_135 = arith.constant 3.125000e-02 : f32
    %223 = vector.broadcast %cst_135 : f32 to vector<8x1xf32>
    %224 = arith.mulf %218, %223 : vector<8x1xf32>
    %225 = arith.mulf %222, %222 : vector<8x1xf32>
    %226 = arith.subf %224, %225 : vector<8x1xf32>
    %cst_136 = arith.constant 0.000000e+00 : f32
    %227 = vector.broadcast %cst_136 : f32 to vector<8x1xf32>
    %228 = arith.maximumf %226, %227 : vector<8x1xf32>
    %cst_137 = arith.constant 9.99999974E-6 : f32
    %229 = vector.broadcast %cst_137 : f32 to vector<8x1xf32>
    %230 = arith.addf %228, %229 : vector<8x1xf32>
    %231 = math.rsqrt %230 : vector<8x1xf32>
    %232 = arith.mulf %219, %231 : vector<8x1xf32>
    %233 = arith.mulf %222, %232 : vector<8x1xf32>
    %234 = arith.subf %220, %233 : vector<8x1xf32>
    %235 = vector.broadcast %232 : vector<8x1xf32> to vector<8x16xf32>
    %236 = arith.mulf %173, %235 : vector<8x16xf32>
    %237 = vector.broadcast %234 : vector<8x1xf32> to vector<8x16xf32>
    %238 = arith.addf %236, %237 : vector<8x16xf32>
    %cst_138 = arith.constant 0.000000e+00 : f32
    %239 = vector.broadcast %cst_138 : f32 to vector<8x16xf32>
    %240 = arith.maximumf %238, %239 : vector<8x16xf32>
    %c0_139 = arith.constant 0 : index
    %c0_140 = arith.constant 0 : index
    %c0_141 = arith.constant 0 : index
    %241 = vector.load %arg19[%c0_139, %c0_140, %c0_141] : memref<2x8x16xf32, #tpu.memory_space<vmem>>, vector<1x8x16xf32>
    %242 = vector.shape_cast %241 : vector<1x8x16xf32> to vector<8x16xf32>
    %243 = vector.shape_cast %240 : vector<8x16xf32> to vector<1x8x16xf32>
    tpu.vector_store %arg19[%c0_139, %c0_140, %c0_141], %243 {strides = array<i32>} : memref<2x8x16xf32, #tpu.memory_space<vmem>>, vector<1x8x16xf32>,
    %244 = vector.broadcast %232 : vector<8x1xf32> to vector<8x16xf32>
    %245 = arith.mulf %211, %244 : vector<8x16xf32>
    %246 = vector.broadcast %234 : vector<8x1xf32> to vector<8x16xf32>
    %247 = arith.addf %245, %246 : vector<8x16xf32>
    %cst_142 = arith.constant 0.000000e+00 : f32
    %248 = vector.broadcast %cst_142 : f32 to vector<8x16xf32>
    %249 = arith.maximumf %247, %248 : vector<8x16xf32>
    %c1_143 = arith.constant 1 : index
    %c0_144 = arith.constant 0 : index
    %c0_145 = arith.constant 0 : index
    %250 = vector.load %arg19[%c1_143, %c0_144, %c0_145] : memref<2x8x16xf32, #tpu.memory_space<vmem>>, vector<1x8x16xf32>
    %251 = vector.shape_cast %250 : vector<1x8x16xf32> to vector<8x16xf32>
    %252 = vector.shape_cast %249 : vector<8x16xf32> to vector<1x8x16xf32>
    tpu.vector_store %arg19[%c1_143, %c0_144, %c0_145], %252 {strides = array<i32>} : memref<2x8x16xf32, #tpu.memory_space<vmem>>, vector<1x8x16xf32>,
    return
  }
  func.func @transform_0(%arg0: i32) -> (i32, i32) {
    %c0_i32 = arith.constant 0 : i32
    %c0_i32_0 = arith.constant 0 : i32
    %c0_i32_1 = arith.constant 0 : i32
    return %c0_i32, %c0_i32_0 : i32, i32
  }
  func.func @transform_1(%arg0: i32) -> (i32, i32, i32) {
    %c0_i32 = arith.constant 0 : i32
    %c0_i32_0 = arith.constant 0 : i32
    %c0_i32_1 = arith.constant 0 : i32
    %c0_i32_2 = arith.constant 0 : i32
    return %c0_i32, %c0_i32_0, %c0_i32_1 : i32, i32, i32
  }
  func.func @transform_2(%arg0: i32) -> (i32, i32, i32) {
    %c0_i32 = arith.constant 0 : i32
    %c0_i32_0 = arith.constant 0 : i32
    %c0_i32_1 = arith.constant 0 : i32
    %c0_i32_2 = arith.constant 0 : i32
    return %c0_i32, %c0_i32_0, %c0_i32_1 : i32, i32, i32
  }
  func.func @transform_3(%arg0: i32) -> (i32, i32) {
    %c0_i32 = arith.constant 0 : i32
    %c0_i32_0 = arith.constant 0 : i32
    %c0_i32_1 = arith.constant 0 : i32
    return %c0_i32, %c0_i32_0 : i32, i32
  }
  func.func @transform_4(%arg0: i32) -> (i32, i32) {
    %c0_i32 = arith.constant 0 : i32
    %c0_i32_0 = arith.constant 0 : i32
    %c0_i32_1 = arith.constant 0 : i32
    return %c0_i32, %c0_i32_0 : i32, i32
  }
  func.func @transform_5(%arg0: i32) -> (i32, i32) {
    %c0_i32 = arith.constant 0 : i32
    %c0_i32_0 = arith.constant 0 : i32
    %c0_i32_1 = arith.constant 0 : i32
    return %c0_i32, %c0_i32_0 : i32, i32
  }
  func.func @transform_6(%arg0: i32) -> (i32, i32) {
    %c0_i32 = arith.constant 0 : i32
    %c0_i32_0 = arith.constant 0 : i32
    %c0_i32_1 = arith.constant 0 : i32
    return %c0_i32, %c0_i32_0 : i32, i32
  }
  func.func @transform_7(%arg0: i32) -> (i32, i32) {
    %c0_i32 = arith.constant 0 : i32
    %c0_i32_0 = arith.constant 0 : i32
    %c0_i32_1 = arith.constant 0 : i32
    return %c0_i32, %c0_i32_0 : i32, i32
  }
  func.func @transform_8(%arg0: i32) -> (i32, i32) {
    %c0_i32 = arith.constant 0 : i32
    %c0_i32_0 = arith.constant 0 : i32
    %c0_i32_1 = arith.constant 0 : i32
    return %c0_i32, %c0_i32_0 : i32, i32
  }
  func.func @transform_9(%arg0: i32) -> (i32, i32) {
    %c0_i32 = arith.constant 0 : i32
    %c0_i32_0 = arith.constant 0 : i32
    %c0_i32_1 = arith.constant 0 : i32
    return %c0_i32, %c0_i32_0 : i32, i32
  }
  func.func @transform_10(%arg0: i32) -> (i32, i32) {
    %c0_i32 = arith.constant 0 : i32
    %c0_i32_0 = arith.constant 0 : i32
    %c0_i32_1 = arith.constant 0 : i32
    return %c0_i32, %c0_i32_0 : i32, i32
  }
  func.func @transform_11(%arg0: i32) -> (i32, i32) {
    %c0_i32 = arith.constant 0 : i32
    %c0_i32_0 = arith.constant 0 : i32
    %c0_i32_1 = arith.constant 0 : i32
    return %c0_i32, %c0_i32_0 : i32, i32
  }
  func.func @transform_12(%arg0: i32) -> (i32, i32) {
    %c0_i32 = arith.constant 0 : i32
    %c0_i32_0 = arith.constant 0 : i32
    %c0_i32_1 = arith.constant 0 : i32
    return %c0_i32, %c0_i32_0 : i32, i32
  }
  func.func @transform_13(%arg0: i32) -> (i32, i32) {
    %c0_i32 = arith.constant 0 : i32
    %c0_i32_0 = arith.constant 0 : i32
    %c0_i32_1 = arith.constant 0 : i32
    return %c0_i32, %c0_i32_0 : i32, i32
  }
  func.func @transform_14(%arg0: i32) -> (i32, i32) {
    %c0_i32 = arith.constant 0 : i32
    %c0_i32_0 = arith.constant 0 : i32
    %c0_i32_1 = arith.constant 0 : i32
    return %c0_i32, %c0_i32_0 : i32, i32
  }
  func.func @transform_15(%arg0: i32) -> (i32, i32) {
    %c0_i32 = arith.constant 0 : i32
    %c0_i32_0 = arith.constant 0 : i32
    %c0_i32_1 = arith.constant 0 : i32
    return %c0_i32, %c0_i32_0 : i32, i32
  }
  func.func @transform_16(%arg0: i32) -> (i32, i32) {
    %c0_i32 = arith.constant 0 : i32
    %c0_i32_0 = arith.constant 0 : i32
    %c0_i32_1 = arith.constant 0 : i32
    return %c0_i32, %c0_i32_0 : i32, i32
  }
  func.func @transform_17(%arg0: i32) -> (i32, i32) {
    %c0_i32 = arith.constant 0 : i32
    %c0_i32_0 = arith.constant 0 : i32
    %c0_i32_1 = arith.constant 0 : i32
    return %c0_i32, %c0_i32_0 : i32, i32
  }
  func.func @transform_18(%arg0: i32) -> (i32, i32, i32) {
    %c0_i32 = arith.constant 0 : i32
    %c0_i32_0 = arith.constant 0 : i32
    %c0_i32_1 = arith.constant 0 : i32
    %c0_i32_2 = arith.constant 0 : i32
    return %c0_i32, %c0_i32_0, %c0_i32_1 : i32, i32, i32
  }
}

</mosaic_0001>

<bundles_post_ra>
// kernel: tpu_custom_call.1
= control target key start
LH: loop header
LB: loop body
LE: loop exit
PB: predicated region body
PF: predicated region fallthrough
CT: control target
= control target key end

     0   :  { %s1822_s0 = inlined_call_operand.vmem [shape: bf16[8,16], index: 0, kind: input, shape index: {}]   ;;  %s1823_s1 = inlined_call_operand.vmem [shape: f32[2,4,8], index: 1, kind: input, shape index: {}]   ;;  %s1824_s2 = inlined_call_operand.vmem [shape: f32[2,4,16], index: 2, kind: input, shape index: {}]   ;;  %s1825_s3 = inlined_call_operand.vmem [shape: bf16[8,4], index: 3, kind: input, shape index: {}]   ;;  %s1826_s4 = inlined_call_operand.vmem [shape: bf16[8,4], index: 4, kind: input, shape index: {}]   ;;  %s1827_s5 = inlined_call_operand.vmem [shape: bf16[8,4], index: 5, kind: input, shape index: {}]   ;;  %s1828_s6 = inlined_call_operand.vmem [shape: bf16[8,4], index: 6, kind: input, shape index: {}]   ;;  %s1829_s7 = inlined_call_operand.vmem [shape: bf16[8,4], index: 7, kind: input, shape index: {}]   ;;  %s1830_s8 = inlined_call_operand.vmem [shape: bf16[8,4], index: 8, kind: input, shape index: {}]   ;;  %s1831_s9 = inlined_call_operand.vmem [shape: f32[8,1], index: 9, kind: input, shape index: {}]   ;;  %s1832_s10 = inlined_call_operand.vmem [shape: f32[8,1], index: 10, kind: input, shape index: {}]   ;;  %s1833_s11 = inlined_call_operand.vmem [shape: f32[8,1], index: 11, kind: input, shape index: {}]   ;;  %s1834_s12 = inlined_call_operand.vmem [shape: bf16[8,8], index: 12, kind: input, shape index: {}]   ;;  %s1835_s13 = inlined_call_operand.vmem [shape: bf16[8,8], index: 13, kind: input, shape index: {}]   ;;  %s1836_s14 = inlined_call_operand.vmem [shape: bf16[8,8], index: 14, kind: input, shape index: {}]   ;;  %s1837_s15 = inlined_call_operand.vmem [shape: f32[8,1], index: 15, kind: input, shape index: {}]   ;;  %s1838_s16 = inlined_call_operand.vmem [shape: f32[8,1], index: 16, kind: input, shape index: {}]   ;;  %s1839_s17 = inlined_call_operand.vmem [shape: f32[8,1], index: 17, kind: input, shape index: {}]   ;;  %s1840_s18 = inlined_call_operand.hbm [shape: f32[2,8,16], index: 18, kind: output, shape index: {}]  }
   0x1   :  { %1843 = sst [smem:[#allocation5_spill]] %s1822_s0 }
   0x2   :  { %1844 = sst [smem:[#allocation6_spill]] %s1823_s1 }
   0x3   :  { %1845 = sst [smem:[#allocation7_spill]] %s1824_s2 }
   0x4   :  { %s1846_s29 = sld [smem:[#allocation5_spill]]  ;;  %vm68_vm0 = vcmask 1043456   ;;  %v1441_v1 = vmov 0.0   ;;  %vm1442_vm1 = vmmov 0   ;;  %vm64_vm2 = vcmask 64512   ;;  %s1443_s22 = smov 16  }
   0x5   :  { %1284 = vmatprep.subr.bf16.mxu0 %v1441_v1  ;;  %1286 = vmatprep.mubr.msk.bf16.mxu0 %vm1442_vm1, %v1441_v1  ;;  %s1847_s19 = sld [smem:[#allocation6_spill]] }
   0x6   :  { %s1848_s21 = sld [smem:[#allocation7_spill]] }
   0xa   :  { %v61_v0 = vld [vmem:[%s1846_s29] sm:$0xf] }
   0xb   :  { %v1550_v2 = vsel %vm68_vm0, %v61_v0, 0  ;;  %v62_v3 = vld [vmem:[%s1847_s19] sm:$0xf] }
   0xc   :  { %v112_v4 = vld [vmem:[%s1848_s21] sm:$0xf]  ;;  %1285 = vmatpush3.bf16.msra.mxu0 %v1550_v2  ;;  %v63_v5 = vpack.c.bf16 %v62_v3, %v62_v3 }
   0xd   :  { %117 = vrot.lane.b32.xlu0 %v112_v4, %s1443_s22 }
   0xe   :  { %23 = vsyncpa [#allocation3], 0  ;;  %1296 = vmatprep.subr.bf16.mxu0 %v1441_v1  ;;  %1290 = vmatprep.subr.bf16.mxu1 %v1441_v1  ;;  %v134_v6 = vpack.c.bf16 %v112_v4, %v112_v4  ;;  %vm141_vm3 = vcmask 1041408   ;;  %v1574_v8 = vld [vmem:[%s1826_s4] sm:$0xf]  ;;  %vm137_vm4 = vcmask 31744   ;;  %v113_v23 = vlaneseq }
   0xf   :  { %1292 = vmatprep.mubr.msk.bf16.mxu1 %vm1442_vm1, %v1441_v1  ;;  %1287 = vmatmul.mubr.msk.bf16.vlgmr.msra.gmra.mxu0 %vm64_vm2, %v63_v5  ;;  %vm116_vm5 = vcmask 1047680   ;;  %s1444_s4 = smov 113   ;;  %v1592_v21 = vld [vmem:[%s1829_s7] sm:$0xf]  ;;  %s1445_s26 = smov 127   ;;  %vm448_vm8 = vcmask 130048  }
  0x10   :  { %1298 = vmatprep.mubr.msk.bf16.mxu0 %vm1442_vm1, %v1441_v1  ;;  %v189_v7 = vsel %vm141_vm3, %v134_v6, 0  ;;  %v1602_v22 = vld [vmem:[%s1848_s21 + $0x4] sm:$0xf]  ;;  %v1606_v24 = vand.u32 127, %v113_v23  ;;  %v1615_v29 = vld [vmem:[%s1825_s3] sm:$0xf] }
  0x11   :  { %1297 = vmatpush3.bf16.msra.mxu0 %v189_v7  ;;  %v1633_v39 = vld [vmem:[%s1827_s5] sm:$0xf]  ;;  %v1229_v56 = vld [vmem:[%s1847_s19 + $0x4] sm:$0xf]  ;;  %v521_v0 = vpack.c.bf16 %v1602_v22, %v1602_v22  ;;  %s1447_s7 = smov [#allocation2]  }
  0x12   :  { %1308 = vmatprep.subr.bf16.mxu0 %v1441_v1  ;;  %vm115_vm6 = vcmp.eq.s32.totalorder %v1606_v24, 0  ;;  %vm128_vm7 = vcmp.eq.s32.totalorder %v1606_v24, 15  ;;  %v1648_v52 = vld [vmem:[%s1828_s6] sm:$0xf]  ;;  %v460_v59 = vpack.c.bf16 %v1229_v56, %v1229_v56  ;;  %s1211_s29 = sshll.u32 %s1447_s7, 4  ;;  %s1212_s29 = int_to_ptr.vmem [resolvable:$true] %s1211_s29 }
  0x13   :  { %v1667_v63 = vld [vmem:[%s1830_s8] sm:$0xf]  ;;  %p1424_p1 = scmp.lt.s32.totalorder %s1212_s29, %s1212_s29 }
  0x17   :  { %1299 = vmatmul.mubr.msk.bf16.vlgmr.msra.gmra.mxu0 %vm137_vm4, %v1574_v8 }
  0x18   :  { %1310 = vmatprep.mubr.msk.bf16.mxu0 %vm1442_vm1, %v1441_v1 }
  0x7f   :  { %v118_v9 = vpop.permute.xlu0 %117 }
  0x80   :  { %v119_v10 = vsel %vm116_vm5, %v118_v9, %v112_v4 }
  0x81   :  { %120 = vrot.lane.b32.xlu1 %v119_v10, %s1443_s22 }
  0xcf   :  { %v106_v11 = vpop.f32.mrf.mxu0 }
  0xd0   :  { %280 = vrot.lane.b32.xlu0 %v106_v11, %s1443_s22  ;;  %v296_v12 = vpack.c.bf16 %v106_v11, %v106_v11 }
  0xd1   :  { %v1288_v13 = vpop.f32.mrf.mxu0 }
  0xd2   :  { %v301_v14 = vsel %vm141_vm3, %v296_v12, 0 }
  0xd3   :  { %v109_v15 = vpop.f32.mrf.mxu0  ;;  %1309 = vmatpush3.bf16.msra.mxu0 %v301_v14 }
  0xd4   :  { %1320 = vmatprep.subr.bf16.mxu0 %v1441_v1 }
  0xd5   :  { %v1289_v16 = vpop.f32.mrf.mxu0 }
  0xd6   :  { %1311 = vmatmul.mubr.msk.bf16.vlgmr.msra.gmra.mxu0 %vm137_vm4, %v1592_v21 }
  0xd7   :  { %1322 = vmatprep.mubr.msk.bf16.mxu0 %vm1442_vm1, %v1441_v1  ;;  %v225_v37 = vpop.f32.mrf.mxu0 }
  0xd9   :  { %v1300_v40 = vpop.f32.mrf.mxu0 }
  0xdb   :  { %v228_v41 = vpop.f32.mrf.mxu0 }
  0xdd   :  { %v1301_v42 = vpop.f32.mrf.mxu0 }
  0xf3   :  { %v121_v17 = vpop.permute.xlu1 %120 }
  0xf4   :  { %v122_v18 = vsel %vm116_vm5, %v121_v17, %v112_v4 }
  0xf5   :  { %124 = vrot.lane.b32.xlu0 %v122_v18, %s1444_s4 }
 0x142   :  { %v281_v19 = vpop.permute.xlu0 %280 }
 0x143   :  { %v282_v20 = vsel %vm116_vm5, %v281_v19, %v106_v11 }
 0x144   :  { %283 = vrot.lane.b32.xlu1 %v282_v20, %s1443_s22 }
 0x148   :  { %129 = vrot.lane.b32.xlu1 %v122_v18, %s1445_s26 }
 0x14c   :  { %506 = vrot.lane.b32.xlu1 %v1602_v22, %s1443_s22 }
 0x167   :  { %v125_v25 = vpop.permute.xlu0 %124 }
 0x168   :  { %v127_v26 = vsel %vm115_vm6, 0.0, %v125_v25 }
 0x169   :  { %v136_v27 = vpack.c.bf16 %v127_v26, %v127_v26 }
 0x16b   :  { %v143_v28 = vsel %vm141_vm3, %v136_v27, 0 }
 0x16c   :  { %1291 = vmatpush3.bf16.msra.mxu1 %v143_v28 }
 0x16d   :  { %1302 = vmatprep.subr.bf16.mxu1 %v1441_v1 }
 0x16f   :  { %1293 = vmatmul.mubr.msk.bf16.vlgmr.msra.gmra.mxu1 %vm137_vm4, %v1615_v29 }
 0x170   :  { %1304 = vmatprep.mubr.msk.bf16.mxu1 %vm1442_vm1, %v1441_v1 }
 0x196   :  { %v337_v43 = vpop.f32.mrf.mxu0 }
 0x198   :  { %v1312_v44 = vpop.f32.mrf.mxu0 }
 0x19a   :  { %v340_v45 = vpop.f32.mrf.mxu0 }
 0x19c   :  { %v1313_v46 = vpop.f32.mrf.mxu0 }
 0x1b6   :  { %v284_v30 = vpop.permute.xlu1 %283 }
 0x1b7   :  { %v285_v31 = vsel %vm116_vm5, %v284_v30, %v106_v11  ;;  %v1446_v30 = vmov 0  }
 0x1b8   :  { %287 = vrot.lane.b32.xlu0 %v285_v31, %s1444_s4  ;;  %1414 = vset.pattern.permute.xlu1 %v1446_v30 }
 0x1b9   :  { %1413 = vset.pattern.permute.xlu0 %v1446_v30 }
 0x1ba   :  { %v130_v32 = vpop.permute.xlu1 %129 }
 0x1bb   :  { %v132_v33 = vsel %vm128_vm7, 0.0, %v130_v32 }
 0x1bc   :  { %v232_v34 = vpack.c.bf16 %v132_v33, %v132_v33 }
 0x1be   :  { %v237_v35 = vsel %vm141_vm3, %v232_v34, 0  ;;  %v507_v36 = vpop.permute.xlu1 %506 }
 0x1bf   :  { %v508_v38 = vsel %vm116_vm5, %v507_v36, %v1602_v22  ;;  %1303 = vmatpush3.bf16.msra.mxu1 %v237_v35 }
 0x1c0   :  { %509 = vrot.lane.b32.xlu1 %v508_v38, %s1443_s22  ;;  %1314 = vmatprep.subr.bf16.mxu1 %v1441_v1 }
 0x1c2   :  { %1305 = vmatmul.mubr.msk.bf16.vlgmr.msra.gmra.mxu1 %vm137_vm4, %v1633_v39 }
 0x1c3   :  { %1316 = vmatprep.mubr.msk.bf16.mxu1 %vm1442_vm1, %v1441_v1 }
 0x1c4   :  { %291 = vrot.lane.b32.xlu1 %v285_v31, %s1445_s26 }
 0x22a   :  { %v288_v47 = vpop.permute.xlu0 %287 }
 0x22b   :  { %v290_v48 = vsel %vm115_vm6, 0.0, %v288_v47 }
 0x22c   :  { %v344_v49 = vpack.c.bf16 %v290_v48, %v290_v48 }
 0x22e   :  { %v349_v50 = vsel %vm141_vm3, %v344_v49, 0 }
 0x22f   :  { %v179_v51 = vpop.f32.mrf.mxu1  ;;  %1315 = vmatpush3.bf16.msra.mxu1 %v349_v50 }
 0x230   :  { %1326 = vmatprep.subr.bf16.mxu1 %v1441_v1  ;;  %v226_v3 = vadd.f32 %v225_v37, %v179_v51 }
 0x231   :  { %v1294_v53 = vpop.f32.mrf.mxu1 }
 0x232   :  { %v510_v54 = vpop.permute.xlu1 %509  ;;  %1317 = vmatmul.mubr.msk.bf16.vlgmr.msra.gmra.mxu1 %vm137_vm4, %v1648_v52 }
 0x233   :  { %v182_v55 = vpop.f32.mrf.mxu1  ;;  %1327 = vmatpush3.bf16.msra.mxu1 %v1550_v2  ;;  %1328 = vmatprep.mubr.msk.bf16.mxu1 %vm1442_vm1, %v1441_v1  ;;  %v567_v2 = vsel %vm141_vm3, %v521_v0, 0  ;;  %v511_v10 = vsel %vm116_vm5, %v510_v54, %v1602_v22 }
 0x234   :  { %1338 = vmatprep.subr.bf16.mxu1 %v1441_v1  ;;  %517 = vrot.lane.b32.xlu1 %v511_v10, %s1445_s26 }
 0x235   :  { %v1295_v57 = vpop.f32.mrf.mxu1 }
 0x236   :  { %v292_v58 = vpop.permute.xlu1 %291 }
 0x237   :  { %v294_v60 = vsel %vm128_vm7, 0.0, %v292_v58 }
 0x238   :  { %v393_v61 = vpack.c.bf16 %v294_v60, %v294_v60 }
 0x23a   :  { %v398_v62 = vsel %vm141_vm3, %v393_v61, 0  ;;  %1329 = vmatmul.mubr.msk.bf16.vlgmr.msra.gmra.mxu1 %vm64_vm2, %v460_v59 }
 0x23b   :  { %1321 = vmatpush3.bf16.msra.mxu0 %v398_v62  ;;  %1340 = vmatprep.mubr.msk.bf16.mxu1 %vm1442_vm1, %v1441_v1 }
 0x23c   :  { %1332 = vmatprep.subr.bf16.mxu0 %v1441_v1  ;;  %1339 = vmatpush3.bf16.msra.mxu1 %v567_v2 }
 0x23d   :  { %1350 = vmatprep.subr.bf16.mxu1 %v1441_v1 }
 0x23e   :  { %1323 = vmatmul.mubr.msk.bf16.vlgmr.msra.gmra.mxu0 %vm137_vm4, %v1667_v63 }
 0x23f   :  { %1334 = vmatprep.mubr.msk.bf16.mxu0 %vm1442_vm1, %v1441_v1 }
 0x242   :  { %1341 = vmatmul.mubr.msk.bf16.vlgmr.msra.gmra.mxu1 %vm137_vm4, %v1574_v8 }
 0x243   :  { %1352 = vmatprep.mubr.msk.bf16.mxu1 %vm1442_vm1, %v1441_v1 }
 0x282   :  { %v273_v4 = vpop.f32.mrf.mxu1 }
 0x283   :  { %v279_v5 = vadd.f32 %v273_v4, %v226_v3 }
 0x284   :  { %v1306_v6 = vpop.f32.mrf.mxu1 }
 0x285   :  { %v338_v11 = vadd.f32 %v337_v43, %v279_v5 }
 0x286   :  { %v276_v7 = vpop.f32.mrf.mxu1 }
 0x288   :  { %v1307_v9 = vpop.f32.mrf.mxu1 }
 0x2a6   :  { %v518_v34 = vpop.permute.xlu1 %517 }
 0x2a7   :  { %v520_v36 = vsel %vm128_vm7, 0.0, %v518_v34 }
 0x2a8   :  { %v609_v41 = vpack.c.bf16 %v520_v36, %v520_v36 }
 0x2aa   :  { %v611_v43 = vsel %vm141_vm3, %v609_v41, 0 }
 0x2f2   :  { %v385_v12 = vpop.f32.mrf.mxu1 }
 0x2f3   :  { %v391_v13 = vadd.f32 %v385_v12, %v338_v11 }
 0x2f4   :  { %v1318_v14 = vpop.f32.mrf.mxu1 }
 0x2f6   :  { %v388_v15 = vpop.f32.mrf.mxu1 }
 0x2f8   :  { %v1319_v8 = vpop.f32.mrf.mxu1 }
 0x2fa   :  { %v498_v16 = vpop.f32.mrf.mxu1 }
 0x2fb   :  { %654 = vrot.lane.b32.xlu0 %v498_v16, %s1443_s22  ;;  %v669_v17 = vpack.c.bf16 %v498_v16, %v498_v16 }
 0x2fc   :  { %v1330_v18 = vpop.f32.mrf.mxu1 }
 0x2fd   :  { %v671_v19 = vsel %vm141_vm3, %v669_v17, 0 }
 0x2fe   :  { %v434_v20 = vpop.f32.mrf.mxu0  ;;  %v501_v23 = vpop.f32.mrf.mxu1  ;;  %1351 = vmatpush3.bf16.msra.mxu1 %v671_v19 }
 0x2ff   :  { %v440_v25 = vadd.f32 %v434_v20, %v391_v13  ;;  %1362 = vmatprep.subr.bf16.mxu1 %v1441_v1 }
 0x300   :  { %v1331_v22 = vpop.f32.mrf.mxu1  ;;  %v1324_v26 = vpop.f32.mrf.mxu0 }
 0x301   :  { %1353 = vmatmul.mubr.msk.bf16.vlgmr.msra.gmra.mxu1 %vm137_vm4, %v1592_v21  ;;  %v441_v21 = vld [vmem:[%s1831_s9] sm:$0xff] }
 0x302   :  { %1364 = vmatprep.mubr.msk.bf16.mxu1 %vm1442_vm1, %v1441_v1  ;;  %v437_v27 = vpop.f32.mrf.mxu0  ;;  %v603_v55 = vpop.f32.mrf.mxu1 }
 0x304   :  { %v1325_v28 = vpop.f32.mrf.mxu0  ;;  %v1342_v56 = vpop.f32.mrf.mxu1 }
 0x306   :  { %v606_v57 = vpop.f32.mrf.mxu1 }
 0x308   :  { %v1343_v58 = vpop.f32.mrf.mxu1 }
 0x309   :  { %v853_v58 = vld [vmem:[%s1835_s13] sm:$0xf] }
 0x36d   :  { %v655_v31 = vpop.permute.xlu0 %654 }
 0x36e   :  { %v656_v32 = vsel %vm116_vm5, %v655_v31, %v498_v16 }
 0x36f   :  { %657 = vrot.lane.b32.xlu0 %v656_v32, %s1443_s22 }
 0x373   :  { %513 = vrot.lane.b32.xlu0 %v511_v10, %s1444_s4 }
 0x3c1   :  { %v707_v59 = vpop.f32.mrf.mxu1 }
 0x3c3   :  { %v1354_v60 = vpop.f32.mrf.mxu1 }
 0x3c5   :  { %v710_v61 = vpop.f32.mrf.mxu1 }
 0x3c7   :  { %v1355_v62 = vpop.f32.mrf.mxu1 }
 0x3e1   :  { %v658_v33 = vpop.permute.xlu0 %657 }
 0x3e2   :  { %v659_v35 = vsel %vm116_vm5, %v658_v33, %v498_v16 }
 0x3e3   :  { %665 = vrot.lane.b32.xlu1 %v659_v35, %s1445_s26  ;;  %661 = vrot.lane.b32.xlu0 %v659_v35, %s1444_s4 }
 0x3e5   :  { %v514_v37 = vpop.permute.xlu0 %513 }
 0x3e6   :  { %v516_v38 = vsel %vm115_vm6, 0.0, %v514_v37 }
 0x3e7   :  { %444 = vperm.xlu0 %1413, %v441_v21   ;;  %v522_v40 = vpack.c.bf16 %v516_v38, %v516_v38 }
 0x3e9   :  { %v524_v42 = vsel %vm141_vm3, %v522_v40, 0  ;;  %v813_v40 = vld [vmem:[%s1832_s10] sm:$0xff] }
 0x3ea   :  { %1333 = vmatpush3.bf16.msra.mxu0 %v524_v42 }
 0x3eb   :  { %1344 = vmatprep.subr.bf16.mxu0 %v1441_v1 }
 0x3ed   :  { %1335 = vmatmul.mubr.msk.bf16.vlgmr.msra.gmra.mxu0 %vm137_vm4, %v1615_v29 }
 0x3ee   :  { %1345 = vmatpush3.bf16.msra.mxu0 %v611_v43  ;;  %1346 = vmatprep.mubr.msk.bf16.mxu0 %vm1442_vm1, %v1441_v1  ;;  %v814_v43 = vld [vmem:[%s1833_s11] sm:$0xff] }
 0x3ef   :  { %1356 = vmatprep.subr.bf16.mxu0 %v1441_v1 }
 0x3f5   :  { %1347 = vmatmul.mubr.msk.bf16.vlgmr.msra.gmra.mxu0 %vm137_vm4, %v1633_v39 }
 0x3f6   :  { %1358 = vmatprep.mubr.msk.bf16.mxu0 %vm1442_vm1, %v1441_v1 }
 0x455   :  { %v666_v44 = vpop.permute.xlu1 %665  ;;  %v662_v45 = vpop.permute.xlu0 %661 }
 0x456   :  { %v668_v46 = vsel %vm128_vm7, 0.0, %v666_v44  ;;  %v664_v29 = vsel %vm115_vm6, 0.0, %v662_v45 }
 0x457   :  { %v758_v47 = vpack.c.bf16 %v668_v46, %v668_v46  ;;  %v713_v48 = vpack.c.bf16 %v664_v29, %v664_v29 }
 0x459   :  { %v760_v49 = vsel %vm141_vm3, %v758_v47, 0  ;;  %v715_v50 = vsel %vm141_vm3, %v713_v48, 0 }
 0x45a   :  { %1357 = vmatpush3.bf16.msra.mxu0 %v715_v50  ;;  %1363 = vmatpush3.bf16.msra.mxu1 %v760_v49 }
 0x45b   :  { %1374 = vmatprep.subr.bf16.mxu1 %v1441_v1  ;;  %1368 = vmatprep.subr.bf16.mxu0 %v1441_v1 }
 0x45d   :  { %1359 = vmatmul.mubr.msk.bf16.vlgmr.msra.gmra.mxu0 %vm137_vm4, %v1648_v52  ;;  %1365 = vmatmul.mubr.msk.bf16.vlgmr.msra.gmra.mxu1 %vm137_vm4, %v1667_v63 }
 0x45e   :  { %1376 = vmatprep.mubr.msk.bf16.mxu1 %vm1442_vm1, %v1441_v1  ;;  %1370 = vmatprep.mubr.msk.bf16.mxu0 %vm1442_vm1, %v1441_v1 }
 0x462   :  { %v445_v39 = vpop.permute.xlu0 %444 }
 0x463   :  { %v1735_v51 = vadd.f32 %v445_v39, %v440_v25 }
 0x465   :  { %v449_v53 = vsel %vm448_vm8, %v1735_v51, 0.0  ;;  %v453_v54 = vmul.f32 %v1735_v51, %v1735_v51 }
 0x466   :  { %450 = vadd.xlane.f32.xlu1 %v449_v53 }
 0x467   :  { %v454_v52 = vsel %vm448_vm8, %v453_v54, 0.0 }
 0x46a   :  { %455 = vadd.xlane.f32.xlu1 %v454_v52 }
 0x4ad   :  { %v560_v63 = vpop.f32.mrf.mxu0 }
 0x4ae   :  { %v604_v0 = vadd.f32 %v603_v55, %v560_v63  ;;  %v998_v63 = vld [vmem:[%s1837_s15] sm:$0xff] }
 0x4af   :  { %v1336_v2 = vpop.f32.mrf.mxu0 }
 0x4b1   :  { %v563_v3 = vpop.f32.mrf.mxu0 }
 0x4b3   :  { %v1337_v4 = vpop.f32.mrf.mxu0 }
 0x4b5   :  { %v647_v5 = vpop.f32.mrf.mxu0 }
 0x4b6   :  { %v653_v6 = vadd.f32 %v647_v5, %v604_v0 }
 0x4b7   :  { %v1348_v7 = vpop.f32.mrf.mxu0 }
 0x4b8   :  { %v708_v9 = vadd.f32 %v707_v59, %v653_v6 }
 0x4b9   :  { %v650_v10 = vpop.f32.mrf.mxu0 }
 0x4bb   :  { %v1349_v11 = vpop.f32.mrf.mxu0 }
 0x4ef   :  { %v451_v27 = vpop.xlane.xlu1 %450 }
 0x4f3   :  { %v456_v32 = vpop.xlane.xlu1 %455 }
 0x51d   :  { %v751_v12 = vpop.f32.mrf.mxu0  ;;  %v796_v13 = vpop.f32.mrf.mxu1 }
 0x51e   :  { %v757_v14 = vadd.f32 %v751_v12, %v708_v9 }
 0x51f   :  { %v1360_v15 = vpop.f32.mrf.mxu0  ;;  %v1366_v8 = vpop.f32.mrf.mxu1 }
 0x520   :  { %v802_v16 = vadd.f32 %v796_v13, %v757_v14  ;;  %v855_v13 = vld [vmem:[%s1834_s12] sm:$0xf] }
 0x521   :  { %v754_v17 = vpop.f32.mrf.mxu0  ;;  %v799_v18 = vpop.f32.mrf.mxu1 }
 0x522   :  { %v803_v19 = vadd.f32 %v802_v16, %v445_v39  ;;  %v949_v18 = vld [vmem:[%s1836_s14] sm:$0xf] }
 0x523   :  { %v1361_v20 = vpop.f32.mrf.mxu0  ;;  %v1367_v23 = vpop.f32.mrf.mxu1 }
 0x524   :  { %v804_v25 = vsel %vm448_vm8, %v803_v19, 0.0  ;;  %v808_v22 = vmul.f32 %v803_v19, %v803_v19 }
 0x525   :  { %805 = vadd.xlane.f32.xlu0 %v804_v25 }
 0x526   :  { %v809_v26 = vsel %vm448_vm8, %v808_v22, 0.0 }
 0x529   :  { %810 = vadd.xlane.f32.xlu0 %v809_v26 }
 0x5ae   :  { %v806_v28 = vpop.xlane.xlu0 %805 }
 0x5af   :  { %v807_v30 = vadd.f32 %v806_v28, %v451_v27 }
 0x5b1   :  { %v815_v31 = vmul.f32 0.03125, %v807_v30 }
 0x5b2   :  { %v811_v33 = vpop.xlane.xlu0 %810 }
 0x5b3   :  { %v812_v34 = vadd.f32 %v811_v33, %v456_v32  ;;  %v817_v35 = vmul.f32 %v815_v31, %v815_v31 }
 0x5b5   :  { %v816_v21 = vmul.f32 0.03125, %v812_v34 }
 0x5b7   :  { %v818_v36 = vsub.f32 %v816_v21, %v817_v35 }
 0x5b9   :  { %v819_v37 = vmax.f32 %v818_v36, 0.0 }
 0x5bb   :  { %v820_v38 = vadd.f32 1e-05, %v819_v37 }
 0x5bd   :  { %1415 = vrsqrt.f32 %v820_v38 }
 0x5ca   :  { %v1416_v41 = vpop.eup %1415 }
 0x5cb   :  { %v822_v42 = vmul.f32 %v1416_v41, %v813_v40 }
 0x5cd   :  { %827 = vperm.xlu1 %1414, %v822_v42   ;;  %v823_v44 = vmul.f32 %v822_v42, %v815_v31 }
 0x5cf   :  { %v824_v45 = vsub.f32 %v814_v43, %v823_v44 }
 0x5d1   :  { %833 = vperm.xlu0 %1413, %v824_v45  }
 0x648   :  { %v828_v46 = vpop.permute.xlu1 %827 }
 0x649   :  { %v830_v29 = vmul.f32 %v828_v46, %v1735_v51  ;;  %v1014_v48 = vmul.f32 %v828_v46, %v803_v19 }
 0x64c   :  { %v834_v47 = vpop.permute.xlu0 %833 }
 0x64d   :  { %v836_v49 = vadd.f32 %v834_v47, %v830_v29  ;;  %v1015_v39 = vadd.f32 %v1014_v48, %v834_v47 }
 0x64f   :  { %v837_v50 = vmax.f32 %v836_v49, 0.0  ;;  %v1016_v54 = vmax.f32 %v1015_v39, 0.0 }
 0x651   :  { %838 = vrot.lane.b32.xlu1 %v837_v50, %s1443_s22  ;;  %v854_v53 = vpack.c.bf16 %v837_v50, %v837_v50  ;;  %v1032_v17 = vpack.c.bf16 %v1016_v54, %v1016_v54 }
 0x653   :  { %v907_v52 = vsel %vm68_vm0, %v854_v53, 0  ;;  %v1078_v19 = vsel %vm68_vm0, %v1032_v17, 0 }
 0x654   :  { %1375 = vmatpush3.bf16.msra.mxu1 %v907_v52 }
 0x655   :  { %1017 = vrot.lane.b32.xlu1 %v1016_v54, %s1443_s22  ;;  %1386 = vmatprep.subr.bf16.mxu1 %v1441_v1 }
 0x657   :  { %1377 = vmatmul.mubr.msk.bf16.vlgmr.msra.gmra.mxu1 %vm64_vm2, %v853_v58 }
 0x658   :  { %1388 = vmatprep.mubr.msk.bf16.mxu1 %vm1442_vm1, %v1441_v1 }
 0x6c3   :  { %v839_v55 = vpop.permute.xlu1 %838 }
 0x6c4   :  { %v840_v56 = vsel %vm116_vm5, %v839_v55, %v837_v50 }
 0x6c5   :  { %841 = vrot.lane.b32.xlu0 %v840_v56, %s1443_s22 }
 0x6c7   :  { %v1018_v51 = vpop.permute.xlu1 %1017 }
 0x6c8   :  { %v1019_v57 = vsel %vm116_vm5, %v1018_v51, %v1016_v54 }
 0x6c9   :  { %1020 = vrot.lane.b32.xlu1 %v1019_v57, %s1443_s22 }
 0x717   :  { %v943_v20 = vpop.f32.mrf.mxu1 }
 0x719   :  { %v1378_v23 = vpop.f32.mrf.mxu1 }
 0x71b   :  { %v946_v25 = vpop.f32.mrf.mxu1 }
 0x71d   :  { %v1379_v22 = vpop.f32.mrf.mxu1 }
 0x737   :  { %v842_v59 = vpop.permute.xlu0 %841 }
 0x738   :  { %v843_v60 = vsel %vm116_vm5, %v842_v59, %v837_v50 }
 0x739   :  { %845 = vrot.lane.b32.xlu0 %v843_v60, %s1444_s4  ;;  %849 = vrot.lane.b32.xlu1 %v843_v60, %s1445_s26 }
 0x73b   :  { %v1021_v61 = vpop.permute.xlu1 %1020 }
 0x73c   :  { %v1022_v62 = vsel %vm116_vm5, %v1021_v61, %v1016_v54 }
 0x73d   :  { %1028 = vrot.lane.b32.xlu1 %v1022_v62, %s1445_s26  ;;  %1024 = vrot.lane.b32.xlu0 %v1022_v62, %s1444_s4 }
 0x741   :  { %1001 = vperm.xlu0 %1413, %v998_v63  }
 0x7ab   :  { %v846_v0 = vpop.permute.xlu0 %845  ;;  %v850_v2 = vpop.permute.xlu1 %849 }
 0x7ac   :  { %v848_v3 = vsel %vm115_vm6, 0.0, %v846_v0  ;;  %v852_v4 = vsel %vm128_vm7, 0.0, %v850_v2 }
 0x7ad   :  { %v856_v5 = vpack.c.bf16 %v848_v3, %v848_v3  ;;  %v950_v7 = vpack.c.bf16 %v852_v4, %v852_v4 }
 0x7af   :  { %v861_v6 = vsel %vm68_vm0, %v856_v5, 0  ;;  %v1025_v9 = vpop.permute.xlu0 %1024  ;;  %v1029_v10 = vpop.permute.xlu1 %1028  ;;  %v955_v15 = vsel %vm68_vm0, %v950_v7, 0 }
 0x7b0   :  { %v1027_v11 = vsel %vm115_vm6, 0.0, %v1025_v9  ;;  %v1031_v12 = vsel %vm128_vm7, 0.0, %v1029_v10  ;;  %1369 = vmatpush3.bf16.msra.mxu0 %v861_v6  ;;  %v1175_v6 = vld [vmem:[%s1838_s16] sm:$0xff]  ;;  %s1419_s16 = scalar_lea.vmem %s1212_s29, 256 }
 0x7b1   :  { %v1033_v14 = vpack.c.bf16 %v1027_v11, %v1027_v11  ;;  %1380 = vmatprep.subr.bf16.mxu0 %v1441_v1  ;;  %v1120_v16 = vpack.c.bf16 %v1031_v12, %v1031_v12  ;;  %v1176_v10 = vld [vmem:[%s1839_s17] sm:$0xff]  ;;  %p1420_p0 = scmp.ne.s32.totalorder %s1212_s29, %s1419_s16  ;;  %p1425_p2 = scmp.lt.s32.totalorder %s1419_s16, %s1419_s16 }
 0x7b3   :  { %v1035_v8 = vsel %vm68_vm0, %v1033_v14, 0  ;;  %1371 = vmatmul.mubr.msk.bf16.vlgmr.msra.gmra.mxu0 %vm64_vm2, %v855_v13  ;;  %v1122_v24 = vsel %vm68_vm0, %v1120_v16, 0  ;;  %p1426_p3 = por %p1425_p2, %p1424_p1 }
 0x7b4   :  { %1381 = vmatpush3.bf16.msra.mxu0 %v955_v15  ;;  %1387 = vmatpush3.bf16.msra.mxu1 %v1035_v8 }
 0x7b5   :  { %1398 = vmatprep.subr.bf16.mxu1 %v1441_v1  ;;  %1382 = vmatprep.mubr.msk.bf16.mxu0 %vm1442_vm1, %v1441_v1  ;;  %p1427_p4 = pnand %p1426_p3, %p1420_p0 }
 0x7b6   :  { %1392 = vmatprep.subr.bf16.mxu0 %v1441_v1 }
 0x7b7   :  { %1389 = vmatmul.mubr.msk.bf16.vlgmr.msra.gmra.mxu1 %vm64_vm2, %v855_v13 }
 0x7b8   :  { %1399 = vmatpush3.bf16.msra.mxu1 %v1122_v24  ;;  %1400 = vmatprep.mubr.msk.bf16.mxu1 %vm1442_vm1, %v1441_v1 }
 0x7bb   :  { %1383 = vmatmul.mubr.msk.bf16.vlgmr.msra.gmra.mxu0 %vm64_vm2, %v949_v18 }
 0x7bc   :  { %1393 = vmatpush3.bf16.msra.mxu0 %v1078_v19  ;;  %1394 = vmatprep.mubr.msk.bf16.mxu0 %vm1442_vm1, %v1441_v1  ;;  %v1002_v21 = vpop.permute.xlu0 %1001 }
 0x7bf   :  { %1401 = vmatmul.mubr.msk.bf16.vlgmr.msra.gmra.mxu1 %vm64_vm2, %v949_v18 }
 0x7c3   :  { %1395 = vmatmul.mubr.msk.bf16.vlgmr.msra.gmra.mxu0 %vm64_vm2, %v853_v58 }
 0x873   :  { %v897_v26 = vpop.f32.mrf.mxu0 }
 0x874   :  { %v944_v33 = vadd.f32 %v943_v20, %v897_v26 }
 0x875   :  { %v1372_v27 = vpop.f32.mrf.mxu0 }
 0x877   :  { %v900_v28 = vpop.f32.mrf.mxu0  ;;  %v1071_v30 = vpop.f32.mrf.mxu1 }
 0x879   :  { %v1373_v31 = vpop.f32.mrf.mxu0  ;;  %v1390_v32 = vpop.f32.mrf.mxu1 }
 0x87b   :  { %v991_v34 = vpop.f32.mrf.mxu0  ;;  %v1074_v35 = vpop.f32.mrf.mxu1 }
 0x87c   :  { %v997_v36 = vadd.f32 %v991_v34, %v944_v33 }
 0x87d   :  { %v1384_v1 = vpop.f32.mrf.mxu0  ;;  %v1391_v37 = vpop.f32.mrf.mxu1 }
 0x87e   :  { %v1004_v38 = vadd.f32 %v1002_v21, %v997_v36 }
 0x87f   :  { %v994_v40 = vpop.f32.mrf.mxu0  ;;  %v1158_v41 = vpop.f32.mrf.mxu1 }
 0x880   :  { %v1005_v42 = vsel %vm448_vm8, %v1004_v38, 0.0  ;;  %v1009_v55 = vmul.f32 %v1004_v38, %v1004_v38 }
 0x881   :  { %1006 = vadd.xlane.f32.xlu1 %v1005_v42  ;;  %v1385_v43 = vpop.f32.mrf.mxu0  ;;  %v1402_v44 = vpop.f32.mrf.mxu1 }
 0x882   :  { %v1010_v51 = vsel %vm448_vm8, %v1009_v55, 0.0 }
 0x883   :  { %v1114_v45 = vpop.f32.mrf.mxu0  ;;  %v1161_v46 = vpop.f32.mrf.mxu1 }
 0x884   :  { %v1115_v29 = vadd.f32 %v1114_v45, %v1071_v30 }
 0x885   :  { %v1396_v47 = vpop.f32.mrf.mxu0  ;;  %v1403_v48 = vpop.f32.mrf.mxu1 }
 0x886   :  { %v1164_v49 = vadd.f32 %v1158_v41, %v1115_v29 }
 0x887   :  { %v1117_v50 = vpop.f32.mrf.mxu0 }
 0x888   :  { %v1165_v39 = vadd.f32 %v1164_v49, %v1002_v21 }
 0x889   :  { %v1397_v53 = vpop.f32.mrf.mxu0 }
 0x88a   :  { %v1166_v54 = vsel %vm448_vm8, %v1165_v39, 0.0  ;;  %v1170_v52 = vmul.f32 %v1165_v39, %v1165_v39 }
 0x88b   :  { %1167 = vadd.xlane.f32.xlu0 %v1166_v54 }
 0x88c   :  { %v1171_v56 = vsel %vm448_vm8, %v1170_v52, 0.0 }
 0x88d   :  { %1172 = vadd.xlane.f32.xlu1 %v1171_v56 }
 0x88f   :  { %1011 = vadd.xlane.f32.xlu0 %v1010_v51 }
 0x90a   :  { %v1007_v57 = vpop.xlane.xlu1 %1006 }
 0x914   :  { %v1168_v58 = vpop.xlane.xlu0 %1167 }
 0x915   :  { %v1169_v59 = vadd.f32 %v1168_v58, %v1007_v57 }
 0x916   :  { %v1173_v61 = vpop.xlane.xlu1 %1172 }
 0x917   :  { %v1177_v60 = vmul.f32 0.03125, %v1169_v59 }
 0x918   :  { %v1012_v62 = vpop.xlane.xlu0 %1011 }
 0x919   :  { %v1174_v63 = vadd.f32 %v1173_v61, %v1012_v62  ;;  %v1179_v0 = vmul.f32 %v1177_v60, %v1177_v60 }
 0x91b   :  { %v1178_v2 = vmul.f32 0.03125, %v1174_v63 }
 0x91d   :  { %v1180_v3 = vsub.f32 %v1178_v2, %v1179_v0 }
 0x91f   :  { %v1181_v4 = vmax.f32 %v1180_v3, 0.0 }
 0x921   :  { %v1182_v5 = vadd.f32 1e-05, %v1181_v4 }
 0x923   :  { %1417 = vrsqrt.f32 %v1182_v5 }
 0x930   :  { %v1418_v7 = vpop.eup %1417 }
 0x931   :  { %v1184_v9 = vmul.f32 %v1418_v7, %v1175_v6 }
 0x933   :  { %1189 = vperm.xlu0 %1413, %v1184_v9   ;;  %v1185_v11 = vmul.f32 %v1184_v9, %v1177_v60 }
 0x935   :  { %v1186_v12 = vsub.f32 %v1176_v10, %v1185_v11 }
 0x937   :  { %1195 = vperm.xlu1 %1414, %v1186_v12  }
 0x9ae   :  { %v1190_v13 = vpop.permute.xlu0 %1189 }
 0x9af   :  { %v1192_v14 = vmul.f32 %v1190_v13, %v1004_v38  ;;  %v1201_v15 = vmul.f32 %v1190_v13, %v1165_v39 }
 0x9b2   :  { %v1196_v8 = vpop.permute.xlu1 %1195 }
 0x9b3   :  { %v1198_v16 = vadd.f32 %v1196_v8, %v1192_v14  ;;  %v1202_v24 = vadd.f32 %v1201_v15, %v1196_v8 }
 0x9b5   :  { %v1199_v17 = vmax.f32 %v1198_v16, 0.0  ;;  %v1203_v18 = vmax.f32 %v1202_v24, 0.0 }
 0x9b7   :  { %1200 = vst.msk [vmem:[#allocation2] sm:$0xff] %vm448_vm8, %v1199_v17  ;;  %1205 = vst.msk [vmem:[#allocation2 + $0x8] sm:$0xff] %vm448_vm8, %v1203_v18 }
 0x9b8   :  { %1430 = shalt.err (!%p1427_p4)
}
 0x9b9   :  { %s1448_s17 = smov 128   ;;  %s1449_s3 = smov 8  }
 0x9ba   :  { %1217 = dma.vmem_to_hbm [thread:$0]  %s1212_s29, 256, %s1840_s18, [#allocation3], %s1448_s17, %s1448_s17, %s1449_s3  }
 0x9bb   :  { %1439 = dma.done.wait [#allocation3], 256  }
 0x9bc   :  { %1440 = vsyncadd [#allocation3], 4294967040 }
 0x9bd   :  { %1221 = vsyncpa [#allocation3], 1 }

</bundles_post_ra>
